<compile_context>
chip_gen: v6e
topology: v6e:2x2x1
jax: 0.10.0
libtpu: 0.0.40
codegen_flags: <defaults>
</compile_context>

<pallas_src>
import math
import functools
import numpy as np
import jax
import jax.numpy as jnp
from jax.experimental import pallas as pl
from jax.experimental.pallas import tpu as pltpu  # noqa: F401

# ----- hyper-parameters (mirror BidirMambav2.__init__ defaults) -----
D_MODEL = 32
D_STATE = 16
D_CONV = 4
EXPAND = 2
D_INNER = EXPAND * D_MODEL            # 64
DT_RANK = math.ceil(D_MODEL / 16)     # 2
RMS_EPS = 1e-5                        # RMSNorm(d_inner)
LN_EPS = 1e-5                         # Block prenorm LayerNorm(d_model)

BATCH = 2
SEQLEN = 8


def _silu(x):
    return x * (1.0 / (1.0 + jnp.exp(-x)))


def _softplus(x):
    # matches torch.nn.functional.softplus (threshold 20)
    return jnp.where(x <= 20.0, jnp.log(1.0 + jnp.exp(x)), x)


def _flip_time(a, seqlen, batch):
    """Reverse the time axis of a time-major (seqlen*batch, W) block (batch order kept)."""
    return jnp.concatenate(
        [a[(seqlen - 1 - s) * batch:(seqlen - s) * batch, :] for s in range(seqlen)],
        axis=0)


# ----------------------------- Pallas kernel -----------------------------
def block_bidir_mamba_kernel(h_ref, ln_w_ref, ln_b_ref, w_in_ref, conv_w_ref,
                             conv_b_ref, w_dproj_ref, dt_bias_ref, w_b_ref,
                             w_c_ref, A_ref, D_ref, rms_w_ref, w_out_ref,
                             tsel_ref, cmask_ref, out_ref, *, batch, seqlen):
    B, L = batch, seqlen
    LB = L * B
    K, Di = conv_w_ref.shape
    N = A_ref.shape[0]

    # ---- Block prenorm: LayerNorm(d_model); residual (= input) is a wrapper passthrough ----
    h = h_ref[...]                                                      # (LB, Dm) time-major
    mu = jnp.mean(h, axis=-1, keepdims=True)
    hc = h - mu
    var = jnp.mean(hc * hc, axis=-1, keepdims=True)
    hn = hc * jax.lax.rsqrt(var + LN_EPS) * ln_w_ref[...] + ln_b_ref[...]

    # ---- in_proj: one fused lane-dense matmul, static x/z split ----
    xz = jnp.dot(hn, w_in_ref[...], preferred_element_type=jnp.float32)  # (LB, 2*Di)
    x = xz[:, :Di]
    z = xz[:, Di:]

    # ---- causal depthwise conv1d (+bias) + SiLU on the whole time-major block ----
    # A time shift is a shift by B rows; (K-1)*B leading zero rows give causal
    # padding AND batch isolation for free (no per-batch split / masks).
    xpad = jnp.concatenate(
        [jnp.zeros(((K - 1) * B, Di), jnp.float32), x], axis=0)          # ((L+K-1)*B, Di)
    acc = jnp.zeros((LB, Di), jnp.float32) + conv_b_ref[...]
    for kk in range(K):
        acc = acc + xpad[kk * B:kk * B + LB, :] * conv_w_ref[kk:kk + 1, :]
    xc = _silu(acc)                                                      # (LB, Di)

    # ---- delta / dx, lane-packed over directions ([fwd | rev] on 128 lanes) ----
    delta = _softplus(jnp.dot(xc, w_dproj_ref[...],
                              preferred_element_type=jnp.float32)
                      + dt_bias_ref[...])                                # (LB, 2*Di)
    # Time-align the reverse half once (rev scan step s processes time L-1-s).
    delta_alg = jnp.concatenate(
        [delta[:, :Di], _flip_time(delta[:, Di:], L, B)], axis=1)        # (LB, 2*Di)
    xc2_alg = jnp.concatenate([xc, _flip_time(xc, L, B)], axis=1)        # (LB, 2*Di)
    dx_alg = delta_alg * xc2_alg                                         # (LB, 2*Di)

    # ---- B / C projections (both directions in one matmul each) ----
    bproj = jax.lax.dot_general(w_b_ref[...], xc, (((1,), (1,)), ((), ())),
                                preferred_element_type=jnp.float32)      # (2N, LB), n on sublanes
    Bf = bproj[:N, :]
    Br = bproj[N:, :]
    cproj = jnp.dot(xc, w_c_ref[...],
                    preferred_element_type=jnp.float32)                  # (LB, 2N), (row, n) layout

    A_pack = A_ref[...]                                                  # (N, 2*Di)

    # ---- merged fwd/rev selective scan: 8 fully-unrolled steps, state (B*N, 2*Di) ----
    # Serial chain per step = one vmul + one vadd on the state; everything else
    # (exp, B broadcast, snapshot split) is state-independent filler.
    hstate = jnp.zeros((B * N, 2 * Di), jnp.float32)
    snaps_hi, snaps_lo = [], []
    for s in range(L):
        rf0 = s * B
        # exp(delta (x) A) for both batch rows / both directions in one wide exp
        rows = [delta_alg[rf0 + b:rf0 + b + 1, :] * A_pack for b in range(B)]
        dA_s = jnp.exp(jnp.concatenate(rows, axis=0))                    # (B*N, 2*Di)
        # dBx = B_t (x) (delta*x)_t  (fwd uses time s, rev uses time L-1-s)
        pieces = []
        for b in range(B):
            rf = rf0 + b
            rr = (L - 1 - s) * B + b
            dxrow = dx_alg[rf:rf + 1, :]                                 # (1, 2*Di)
            pf = Bf[:, rf:rf + 1] * dxrow[:, :Di]                        # (N, Di)
            pr = Br[:, rr:rr + 1] * dxrow[:, Di:]                        # (N, Di)
            pieces.append(jnp.concatenate([pf, pr], axis=1))             # (N, 2*Di)
        dBx_s = jnp.concatenate(pieces, axis=0)                          # (B*N, 2*Di)
        hstate = dA_s * hstate + dBx_s
        # snapshot as bf16 hi/lo pair: same vreg budget as one f32 copy, keeps the
        # deferred C·h readout f32-faithful without spilling the register file.
        s_hi = hstate.astype(jnp.bfloat16)
        s_lo = (hstate - s_hi.astype(jnp.float32)).astype(jnp.bfloat16)
        snaps_hi.append(s_hi)
        snaps_lo.append(s_lo)

    H_hi = jnp.concatenate(snaps_hi, axis=0)                             # (LB*N, 2*Di) bf16
    H_lo = jnp.concatenate(snaps_lo, axis=0)

    # ---- deferred C·h readout: one block-diagonal MXU contraction over all steps ----
    # Ccat[(fwd rows | rev rows), n] ; tsel tiles it to (2LB, LB*N); cmask selects the
    # snapshot block (fwd row r -> block r, rev row t -> block of its scan step).
    Ccat = jnp.concatenate([cproj[:, :N], cproj[:, N:]], axis=0)         # (2*LB, N)
    c_hi = Ccat.astype(jnp.bfloat16)
    c_lo = (Ccat - c_hi.astype(jnp.float32)).astype(jnp.bfloat16)
    tsel = tsel_ref[...]                                                 # (N, LB*N) bf16 0/1
    cmask = cmask_ref[...]                                               # (2*LB, LB*N) f32 0/1
    cb_hi = (jnp.dot(c_hi, tsel, preferred_element_type=jnp.float32) * cmask
             ).astype(jnp.bfloat16)
    cb_lo = (jnp.dot(c_lo, tsel, preferred_element_type=jnp.float32) * cmask
             ).astype(jnp.bfloat16)
    y_big = (jnp.dot(cb_hi, H_hi, preferred_element_type=jnp.float32)
             + jnp.dot(cb_hi, H_lo, preferred_element_type=jnp.float32)
             + jnp.dot(cb_lo, H_hi, preferred_element_type=jnp.float32))  # (2*LB, 2*Di)

    # fwd rows are valid on lanes [:Di], rev rows (already time-ordered) on [Di:]
    y_acc = y_big[:LB, :Di] + y_big[LB:, Di:] + xc * D_ref[...]          # (LB, Di)

    # ---- RMSNorm(d_inner) -> SiLU(z) gating -> out_proj ----
    inv_rms = jax.lax.rsqrt(jnp.mean(y_acc * y_acc, axis=-1, keepdims=True) + RMS_EPS)
    y = y_acc * inv_rms * rms_w_ref[...]
    y = y * _silu(z)
    out_ref[...] = jnp.dot(y, w_out_ref[...], preferred_element_type=jnp.float32)


# ------------------------------- wrapper -------------------------------
def block_forward(hidden, kp):
    """Block.forward(hidden, residual=None) -> (mixer_out, residual)."""
    B, L, Dm = hidden.shape
    # time-major rows (t*B + b): every scan step is a contiguous sublane slice
    h_tm = jnp.transpose(hidden, (1, 0, 2)).reshape(L * B, Dm)
    kernel = functools.partial(block_bidir_mamba_kernel, batch=B, seqlen=L)
    out_tm = pl.pallas_call(
        kernel,
        out_shape=jax.ShapeDtypeStruct((L * B, Dm), jnp.float32),
    )(h_tm, kp["ln_w"], kp["ln_b"], kp["w_in"], kp["conv_w"], kp["conv_b"],
      kp["w_dproj"], kp["dt_bias"], kp["w_b"], kp["w_c"], kp["A"], kp["D"],
      kp["rms_w"], kp["w_out"], kp["tsel"], kp["cmask"])
    out = jnp.transpose(out_tm.reshape(L, B, Dm), (1, 0, 2))
    residual = hidden   # Block: residual == hidden_states when residual arg is None
    return out, residual


# ------------------------- deterministic parameters -------------------------
def init_params(key):
    Dm, Di, N, R, K = D_MODEL, D_INNER, D_STATE, DT_RANK, D_CONV
    ks = jax.random.split(key, 10)

    in_proj_w = jax.random.normal(ks[0], (2 * Di, Dm), jnp.float32) / np.sqrt(Dm)
    conv_w = jax.random.uniform(ks[1], (Di, 1, K), jnp.float32, -1.0, 1.0) / np.sqrt(K)
    conv_b = jax.random.uniform(ks[2], (Di,), jnp.float32, -0.5, 0.5)
    x_proj_w = jax.random.normal(ks[3], (2, R + 2 * N, Di), jnp.float32) / np.sqrt(Di)

    dt_std = R ** (-0.5)
    dt_projs_w = jax.random.uniform(ks[4], (2, Di, R), jnp.float32, -dt_std, dt_std)
    dt = jnp.exp(jax.random.uniform(ks[5], (2, Di), jnp.float32)
                 * (np.log(0.1) - np.log(0.001)) + np.log(0.001))
    dt = jnp.maximum(dt, 1e-4)
    dt_projs_b = dt + jnp.log(-jnp.expm1(-dt))        # inverse-softplus init

    A_logs = jnp.log(jnp.tile(jnp.arange(1, N + 1, dtype=jnp.float32)[None, :],
                              (2 * Di, 1)))           # (2*Di, N)
    Ds = jnp.ones((2 * Di,), jnp.float32)
    rms_w = 1.0 + 0.1 * jax.random.normal(ks[6], (Di,), jnp.float32)
    out_proj_w = jax.random.normal(ks[7], (Dm, Di), jnp.float32) / np.sqrt(Di)
    ln_w = 1.0 + 0.1 * jax.random.normal(ks[8], (Dm,), jnp.float32)
    ln_b = 0.1 * jax.random.normal(ks[9], (Dm,), jnp.float32)

    A = -jnp.exp(A_logs).reshape(2, Di, N)

    return {
        "ln_w": ln_w.reshape(1, Dm), "ln_b": ln_b.reshape(1, Dm),
        "w_in_x": jnp.transpose(in_proj_w[:Di]),                  # (Dm, Di)
        "w_in_z": jnp.transpose(in_proj_w[Di:]),                  # (Dm, Di)
        "conv_w": jnp.transpose(conv_w[:, 0, :]),                 # (K, Di)
        "conv_b": conv_b.reshape(1, Di),
        "w_dtl": jnp.transpose(x_proj_w[:, :R, :], (0, 2, 1)),    # (2, Di, R)
        "w_B": x_proj_w[:, R:R + N, :],                           # (2, N, Di)
        "w_C": x_proj_w[:, R + N:, :],                            # (2, N, Di)
        "w_dt": jnp.transpose(dt_projs_w, (0, 2, 1)),             # (2, R, Di)
        "dt_bias": dt_projs_b.reshape(2, 1, Di),
        "A_T": jnp.transpose(A, (0, 2, 1)),                       # (2, N, Di)
        "D": Ds.reshape(2, 1, Di),
        "rms_w": rms_w.reshape(1, Di),
        "w_out": jnp.transpose(out_proj_w),                       # (Di, Dm)
    }


def pack_kernel_params(p):
    """Offline weight packing (plain-JAX/numpy glue) into the fused, lane-packed layout."""
    Di, N, L, B = D_INNER, D_STATE, SEQLEN, BATCH
    LB = L * B
    w_in = jnp.concatenate([p["w_in_x"], p["w_in_z"]], axis=1)          # (Dm, 2*Di)
    # Pre-fuse the rank-R dt path; pack both directions along lanes.
    w_dproj = jnp.concatenate(
        [p["w_dtl"][k] @ p["w_dt"][k] for k in range(2)], axis=1)       # (Di, 2*Di)
    w_b = jnp.concatenate([p["w_B"][0], p["w_B"][1]], axis=0)           # (2N, Di) -> (n, r) proj
    w_c = jnp.concatenate([jnp.transpose(p["w_C"][0]),
                           jnp.transpose(p["w_C"][1])], axis=1)         # (Di, 2N) -> (r, n) proj
    A = jnp.concatenate([p["A_T"][0], p["A_T"][1]], axis=1)             # (N, 2*Di)
    dt_bias = jnp.concatenate([p["dt_bias"][0], p["dt_bias"][1]], axis=1)  # (1, 2*Di)
    D_sum = p["D"][0] + p["D"][1]                                       # (1, Di)

    # Constant selector matrices for the deferred block-diagonal C·h contraction.
    tsel = np.zeros((N, LB * N), np.float32)
    tsel[np.arange(LB * N) % N, np.arange(LB * N)] = 1.0                # tiles Ccat along lanes
    cmask = np.zeros((2 * LB, LB * N), np.float32)
    for r in range(LB):
        cmask[r, r * N:(r + 1) * N] = 1.0                               # fwd row r <- snapshot block r
        t, b = divmod(r, B)
        blk = (SEQLEN - 1 - t) * B + b                                  # rev time t -> scan step L-1-t
        cmask[LB + r, blk * N:(blk + 1) * N] = 1.0

    return {
        "ln_w": p["ln_w"], "ln_b": p["ln_b"],
        "w_in": w_in, "conv_w": p["conv_w"], "conv_b": p["conv_b"],
        "w_dproj": w_dproj, "dt_bias": dt_bias, "w_b": w_b, "w_c": w_c,
        "A": A, "D": D_sum, "rms_w": p["rms_w"], "w_out": p["w_out"],
        "tsel": jnp.asarray(tsel, dtype=jnp.bfloat16),
        "cmask": jnp.asarray(cmask, dtype=jnp.float32),
    }


# ----------------------------- pure-JAX reference -----------------------------
def reference_forward(hidden, p):
    B, L, _ = hidden.shape
    Di, N, K = D_INNER, D_STATE, D_CONV

    # Block: Add (residual=None) -> LayerNorm -> mixer
    mu = jnp.mean(hidden, axis=-1, keepdims=True)
    var = jnp.mean((hidden - mu) ** 2, axis=-1, keepdims=True)
    hn = (hidden - mu) * jax.lax.rsqrt(var + LN_EPS) * p["ln_w"] + p["ln_b"]

    x = hn @ p["w_in_x"]
    z = hn @ p["w_in_z"]

    xpad = jnp.pad(x, ((0, 0), (K - 1, 0), (0, 0)))
    acc = jnp.zeros_like(x) + p["conv_b"]
    for kk in range(K):
        acc = acc + xpad[:, kk:kk + L, :] * p["conv_w"][kk]
    xc = acc * (1.0 / (1.0 + jnp.exp(-acc)))

    y = jnp.zeros((B, L, Di), jnp.float32)
    for k in range(2):
        Bmat = xc @ jnp.transpose(p["w_B"][k])        # (B, L, N)
        Cmat = xc @ jnp.transpose(p["w_C"][k])        # (B, L, N)
        dts = (xc @ p["w_dtl"][k]) @ p["w_dt"][k]     # (B, L, Di)
        du = dts + p["dt_bias"][k]
        delta = jnp.where(du <= 20.0, jnp.log(1.0 + jnp.exp(du)), du)
        A_k = p["A_T"][k]                             # (N, Di)
        hstate = jnp.zeros((B, N, Di), jnp.float32)
        yk = jnp.zeros((B, L, Di), jnp.float32)
        order = range(L) if k == 0 else range(L - 1, -1, -1)
        for t in order:
            dlt = delta[:, t, :]
            x_t = xc[:, t, :]
            dA = jnp.exp(dlt[:, None, :] * A_k[None])
            dBx = Bmat[:, t, :, None] * (dlt * x_t)[:, None, :]
            hstate = dA * hstate + dBx
            y_t = jnp.einsum("bn,bnd->bd", Cmat[:, t, :], hstate)
            yk = yk.at[:, t, :].set(y_t)
        y = y + yk + xc * p["D"][k]

    inv = jax.lax.rsqrt(jnp.mean(y * y, axis=-1, keepdims=True) + RMS_EPS)
    y = y * inv * p["rms_w"]
    y = y * (z * (1.0 / (1.0 + jnp.exp(-z))))
    return y @ p["w_out"]


if __name__ == "__main__":
    key = jax.random.PRNGKey(0)
    pkey, hkey = jax.random.split(key)
    ref_params = init_params(pkey)
    kparams = pack_kernel_params(ref_params)
    hidden = jax.random.normal(hkey, (BATCH, SEQLEN, D_MODEL), jnp.float32)

    out, residual = block_forward(hidden, kparams)
    out = jax.block_until_ready(out)

    ref = reference_forward(hidden, ref_params)
    assert out.shape == (BATCH, SEQLEN, D_MODEL)
    assert residual.shape == (BATCH, SEQLEN, D_MODEL)
    if not np.allclose(np.asarray(out), np.asarray(ref), atol=5e-3, rtol=5e-3):
        raise AssertionError("Pallas kernel does not match JAX reference")
    print("KERNEL_OK")
</pallas_src>

<mosaic_0001>
module attributes {stable_mosaic.version = 11 : i64} {
  func.func @block_bidir_mamba_kernel(%arg0: memref<16x32xf32, #tpu.memory_space<vmem>>, %arg1: memref<1x32xf32, #tpu.memory_space<vmem>>, %arg2: memref<1x32xf32, #tpu.memory_space<vmem>>, %arg3: memref<32x128xf32, #tpu.memory_space<vmem>>, %arg4: memref<4x64xf32, #tpu.memory_space<vmem>>, %arg5: memref<1x64xf32, #tpu.memory_space<vmem>>, %arg6: memref<64x128xf32, #tpu.memory_space<vmem>>, %arg7: memref<1x128xf32, #tpu.memory_space<vmem>>, %arg8: memref<32x64xf32, #tpu.memory_space<vmem>>, %arg9: memref<64x32xf32, #tpu.memory_space<vmem>>, %arg10: memref<16x128xf32, #tpu.memory_space<vmem>>, %arg11: memref<1x64xf32, #tpu.memory_space<vmem>>, %arg12: memref<1x64xf32, #tpu.memory_space<vmem>>, %arg13: memref<64x32xf32, #tpu.memory_space<vmem>>, %arg14: memref<16x256xbf16, #tpu.memory_space<vmem>>, %arg15: memref<32x256xf32, #tpu.memory_space<vmem>>, %arg16: memref<16x32xf32, #tpu.memory_space<vmem>>) attributes {dimension_semantics = [], scalar_prefetch = 0 : i64, scratch_operands = 0 : i64, tpu.core_type = #tpu.core_type<tc>} {
    %c0 = arith.constant 0 : index
    %c0_0 = arith.constant 0 : index
    %0 = vector.load %arg0[%c0, %c0_0] : memref<16x32xf32, #tpu.memory_space<vmem>>, vector<16x32xf32>
    %cst = arith.constant dense<0.000000e+00> : vector<16xf32>
    %1 = vector.multi_reduction <add>, %0, %cst [1] : vector<16x32xf32> to vector<16xf32>
    %2 = vector.shape_cast %1 : vector<16xf32> to vector<16x1xf32>
    %cst_1 = arith.constant 3.200000e+01 : f32
    %3 = vector.broadcast %cst_1 : f32 to vector<16x1xf32>
    %4 = arith.divf %2, %3 : vector<16x1xf32>
    %5 = vector.broadcast %4 : vector<16x1xf32> to vector<16x32xf32>
    %6 = arith.subf %0, %5 : vector<16x32xf32>
    %7 = arith.mulf %6, %6 : vector<16x32xf32>
    %cst_2 = arith.constant dense<0.000000e+00> : vector<16xf32>
    %8 = vector.multi_reduction <add>, %7, %cst_2 [1] : vector<16x32xf32> to vector<16xf32>
    %9 = vector.shape_cast %8 : vector<16xf32> to vector<16x1xf32>
    %cst_3 = arith.constant 3.200000e+01 : f32
    %10 = vector.broadcast %cst_3 : f32 to vector<16x1xf32>
    %11 = arith.divf %9, %10 : vector<16x1xf32>
    %cst_4 = arith.constant 9.99999974E-6 : f32
    %12 = vector.broadcast %cst_4 : f32 to vector<16x1xf32>
    %13 = arith.addf %11, %12 : vector<16x1xf32>
    %14 = math.rsqrt %13 : vector<16x1xf32>
    %15 = vector.broadcast %14 : vector<16x1xf32> to vector<16x32xf32>
    %16 = arith.mulf %6, %15 : vector<16x32xf32>
    %c0_5 = arith.constant 0 : index
    %c0_6 = arith.constant 0 : index
    %17 = vector.load %arg1[%c0_5, %c0_6] : memref<1x32xf32, #tpu.memory_space<vmem>>, vector<1x32xf32>
    %18 = vector.broadcast %17 : vector<1x32xf32> to vector<16x32xf32>
    %19 = arith.mulf %16, %18 : vector<16x32xf32>
    %c0_7 = arith.constant 0 : index
    %c0_8 = arith.constant 0 : index
    %20 = vector.load %arg2[%c0_7, %c0_8] : memref<1x32xf32, #tpu.memory_space<vmem>>, vector<1x32xf32>
    %21 = vector.broadcast %20 : vector<1x32xf32> to vector<16x32xf32>
    %22 = arith.addf %19, %21 : vector<16x32xf32>
    %c0_9 = arith.constant 0 : index
    %c0_10 = arith.constant 0 : index
    %23 = vector.load %arg3[%c0_9, %c0_10] : memref<32x128xf32, #tpu.memory_space<vmem>>, vector<32x128xf32>
    %cst_11 = arith.constant dense<0.000000e+00> : vector<16x128xf32>
    %24 = tpu.matmul %22, %23, %cst_11 {dimension_numbers = #tpu.dot_dimension_numbers<[1], [0], [0], [1], [0, 0, 1, 1], [], []>} : vector<16x32xf32>, vector<32x128xf32>, vector<16x128xf32> -> vector<16x128xf32>
    %25 = vector.extract_strided_slice %24 {offsets = [0, 0], sizes = [16, 64], strides = [1, 1]} : vector<16x128xf32> to vector<16x64xf32>
    %26 = vector.extract_strided_slice %24 {offsets = [0, 64], sizes = [16, 64], strides = [1, 1]} : vector<16x128xf32> to vector<16x64xf32>
    %cst_12 = arith.constant 0.000000e+00 : f32
    %27 = vector.broadcast %cst_12 : f32 to vector<6x64xf32>
    %28 = tpu.concatenate %27, %25 in 0 : vector<6x64xf32>, vector<16x64xf32> -> vector<22x64xf32>
    %cst_13 = arith.constant 0.000000e+00 : f32
    %29 = vector.broadcast %cst_13 : f32 to vector<16x64xf32>
    %c0_14 = arith.constant 0 : index
    %c0_15 = arith.constant 0 : index
    %30 = vector.load %arg5[%c0_14, %c0_15] : memref<1x64xf32, #tpu.memory_space<vmem>>, vector<1x64xf32>
    %31 = vector.broadcast %30 : vector<1x64xf32> to vector<16x64xf32>
    %32 = arith.addf %29, %31 : vector<16x64xf32>
    %33 = vector.extract_strided_slice %28 {offsets = [0, 0], sizes = [16, 64], strides = [1, 1]} : vector<22x64xf32> to vector<16x64xf32>
    %c0_16 = arith.constant 0 : index
    %c0_17 = arith.constant 0 : index
    %34 = vector.load %arg4[%c0_16, %c0_17] : memref<4x64xf32, #tpu.memory_space<vmem>>, vector<1x64xf32>
    %35 = vector.broadcast %34 : vector<1x64xf32> to vector<16x64xf32>
    %36 = arith.mulf %33, %35 : vector<16x64xf32>
    %37 = arith.addf %32, %36 : vector<16x64xf32>
    %38 = vector.extract_strided_slice %28 {offsets = [2, 0], sizes = [16, 64], strides = [1, 1]} : vector<22x64xf32> to vector<16x64xf32>
    %c1 = arith.constant 1 : index
    %c0_18 = arith.constant 0 : index
    %39 = vector.load %arg4[%c1, %c0_18] : memref<4x64xf32, #tpu.memory_space<vmem>>, vector<1x64xf32>
    %40 = vector.broadcast %39 : vector<1x64xf32> to vector<16x64xf32>
    %41 = arith.mulf %38, %40 : vector<16x64xf32>
    %42 = arith.addf %37, %41 : vector<16x64xf32>
    %43 = vector.extract_strided_slice %28 {offsets = [4, 0], sizes = [16, 64], strides = [1, 1]} : vector<22x64xf32> to vector<16x64xf32>
    %c2 = arith.constant 2 : index
    %c0_19 = arith.constant 0 : index
    %44 = vector.load %arg4[%c2, %c0_19] : memref<4x64xf32, #tpu.memory_space<vmem>>, vector<1x64xf32>
    %45 = vector.broadcast %44 : vector<1x64xf32> to vector<16x64xf32>
    %46 = arith.mulf %43, %45 : vector<16x64xf32>
    %47 = arith.addf %42, %46 : vector<16x64xf32>
    %48 = vector.extract_strided_slice %28 {offsets = [6, 0], sizes = [16, 64], strides = [1, 1]} : vector<22x64xf32> to vector<16x64xf32>
    %c3 = arith.constant 3 : index
    %c0_20 = arith.constant 0 : index
    %49 = vector.load %arg4[%c3, %c0_20] : memref<4x64xf32, #tpu.memory_space<vmem>>, vector<1x64xf32>
    %50 = vector.broadcast %49 : vector<1x64xf32> to vector<16x64xf32>
    %51 = arith.mulf %48, %50 : vector<16x64xf32>
    %52 = arith.addf %47, %51 : vector<16x64xf32>
    %cst_21 = arith.constant 0.000000e+00 : f32
    %53 = vector.broadcast %cst_21 : f32 to vector<16x64xf32>
    %54 = arith.subf %53, %52 : vector<16x64xf32>
    %55 = math.exp %54 : vector<16x64xf32>
    %cst_22 = arith.constant 1.000000e+00 : f32
    %56 = vector.broadcast %cst_22 : f32 to vector<16x64xf32>
    %57 = arith.addf %56, %55 : vector<16x64xf32>
    %cst_23 = arith.constant 1.000000e+00 : f32
    %58 = vector.broadcast %cst_23 : f32 to vector<16x64xf32>
    %59 = arith.divf %58, %57 : vector<16x64xf32>
    %60 = arith.mulf %52, %59 : vector<16x64xf32>
    %c0_24 = arith.constant 0 : index
    %c0_25 = arith.constant 0 : index
    %61 = vector.load %arg6[%c0_24, %c0_25] : memref<64x128xf32, #tpu.memory_space<vmem>>, vector<64x128xf32>
    %cst_26 = arith.constant dense<0.000000e+00> : vector<16x128xf32>
    %62 = tpu.matmul %60, %61, %cst_26 {dimension_numbers = #tpu.dot_dimension_numbers<[1], [0], [0], [1], [0, 0, 1, 1], [], []>} : vector<16x64xf32>, vector<64x128xf32>, vector<16x128xf32> -> vector<16x128xf32>
    %c0_27 = arith.constant 0 : index
    %c0_28 = arith.constant 0 : index
    %63 = vector.load %arg7[%c0_27, %c0_28] : memref<1x128xf32, #tpu.memory_space<vmem>>, vector<1x128xf32>
    %64 = vector.broadcast %63 : vector<1x128xf32> to vector<16x128xf32>
    %65 = arith.addf %62, %64 : vector<16x128xf32>
    %cst_29 = arith.constant 2.000000e+01 : f32
    %66 = vector.broadcast %cst_29 : f32 to vector<16x128xf32>
    %67 = arith.cmpf ole, %65, %66 : vector<16x128xf32>
    %68 = math.exp %65 : vector<16x128xf32>
    %cst_30 = arith.constant 1.000000e+00 : f32
    %69 = vector.broadcast %cst_30 : f32 to vector<16x128xf32>
    %70 = arith.addf %69, %68 : vector<16x128xf32>
    %71 = math.log %70 : vector<16x128xf32>
    %72 = arith.select %67, %71, %65 : vector<16x128xi1>, vector<16x128xf32>
    %73 = vector.extract_strided_slice %72 {offsets = [0, 0], sizes = [16, 64], strides = [1, 1]} : vector<16x128xf32> to vector<16x64xf32>
    %74 = vector.extract_strided_slice %72 {offsets = [0, 64], sizes = [16, 64], strides = [1, 1]} : vector<16x128xf32> to vector<16x64xf32>
    %75 = vector.extract_strided_slice %74 {offsets = [14, 0], sizes = [2, 64], strides = [1, 1]} : vector<16x64xf32> to vector<2x64xf32>
    %76 = vector.extract_strided_slice %74 {offsets = [12, 0], sizes = [2, 64], strides = [1, 1]} : vector<16x64xf32> to vector<2x64xf32>
    %77 = vector.extract_strided_slice %74 {offsets = [10, 0], sizes = [2, 64], strides = [1, 1]} : vector<16x64xf32> to vector<2x64xf32>
    %78 = vector.extract_strided_slice %74 {offsets = [8, 0], sizes = [2, 64], strides = [1, 1]} : vector<16x64xf32> to vector<2x64xf32>
    %79 = vector.extract_strided_slice %74 {offsets = [6, 0], sizes = [2, 64], strides = [1, 1]} : vector<16x64xf32> to vector<2x64xf32>
    %80 = vector.extract_strided_slice %74 {offsets = [4, 0], sizes = [2, 64], strides = [1, 1]} : vector<16x64xf32> to vector<2x64xf32>
    %81 = vector.extract_strided_slice %74 {offsets = [2, 0], sizes = [2, 64], strides = [1, 1]} : vector<16x64xf32> to vector<2x64xf32>
    %82 = vector.extract_strided_slice %74 {offsets = [0, 0], sizes = [2, 64], strides = [1, 1]} : vector<16x64xf32> to vector<2x64xf32>
    %83 = tpu.concatenate %75, %76, %77, %78, %79, %80, %81, %82 in 0 : vector<2x64xf32>, vector<2x64xf32>, vector<2x64xf32>, vector<2x64xf32>, vector<2x64xf32>, vector<2x64xf32>, vector<2x64xf32>, vector<2x64xf32> -> vector<16x64xf32>
    %84 = tpu.concatenate %73, %83 in 1 : vector<16x64xf32>, vector<16x64xf32> -> vector<16x128xf32>
    %85 = vector.extract_strided_slice %60 {offsets = [14, 0], sizes = [2, 64], strides = [1, 1]} : vector<16x64xf32> to vector<2x64xf32>
    %86 = vector.extract_strided_slice %60 {offsets = [12, 0], sizes = [2, 64], strides = [1, 1]} : vector<16x64xf32> to vector<2x64xf32>
    %87 = vector.extract_strided_slice %60 {offsets = [10, 0], sizes = [2, 64], strides = [1, 1]} : vector<16x64xf32> to vector<2x64xf32>
    %88 = vector.extract_strided_slice %60 {offsets = [8, 0], sizes = [2, 64], strides = [1, 1]} : vector<16x64xf32> to vector<2x64xf32>
    %89 = vector.extract_strided_slice %60 {offsets = [6, 0], sizes = [2, 64], strides = [1, 1]} : vector<16x64xf32> to vector<2x64xf32>
    %90 = vector.extract_strided_slice %60 {offsets = [4, 0], sizes = [2, 64], strides = [1, 1]} : vector<16x64xf32> to vector<2x64xf32>
    %91 = vector.extract_strided_slice %60 {offsets = [2, 0], sizes = [2, 64], strides = [1, 1]} : vector<16x64xf32> to vector<2x64xf32>
    %92 = vector.extract_strided_slice %60 {offsets = [0, 0], sizes = [2, 64], strides = [1, 1]} : vector<16x64xf32> to vector<2x64xf32>
    %93 = tpu.concatenate %85, %86, %87, %88, %89, %90, %91, %92 in 0 : vector<2x64xf32>, vector<2x64xf32>, vector<2x64xf32>, vector<2x64xf32>, vector<2x64xf32>, vector<2x64xf32>, vector<2x64xf32>, vector<2x64xf32> -> vector<16x64xf32>
    %94 = tpu.concatenate %60, %93 in 1 : vector<16x64xf32>, vector<16x64xf32> -> vector<16x128xf32>
    %95 = arith.mulf %84, %94 : vector<16x128xf32>
    %c0_31 = arith.constant 0 : index
    %c0_32 = arith.constant 0 : index
    %96 = vector.load %arg8[%c0_31, %c0_32] : memref<32x64xf32, #tpu.memory_space<vmem>>, vector<32x64xf32>
    %cst_33 = arith.constant dense<0.000000e+00> : vector<32x16xf32>
    %97 = tpu.matmul %96, %60, %cst_33 {dimension_numbers = #tpu.dot_dimension_numbers<[1], [1], [0], [0], [0, 0, 1, 0], [], []>} : vector<32x64xf32>, vector<16x64xf32>, vector<32x16xf32> -> vector<32x16xf32>
    %98 = vector.extract_strided_slice %97 {offsets = [0, 0], sizes = [16, 16], strides = [1, 1]} : vector<32x16xf32> to vector<16x16xf32>
    %99 = vector.extract_strided_slice %97 {offsets = [16, 0], sizes = [16, 16], strides = [1, 1]} : vector<32x16xf32> to vector<16x16xf32>
    %c0_34 = arith.constant 0 : index
    %c0_35 = arith.constant 0 : index
    %100 = vector.load %arg9[%c0_34, %c0_35] : memref<64x32xf32, #tpu.memory_space<vmem>>, vector<64x32xf32>
    %cst_36 = arith.constant dense<0.000000e+00> : vector<16x32xf32>
    %101 = tpu.matmul %60, %100, %cst_36 {dimension_numbers = #tpu.dot_dimension_numbers<[1], [0], [0], [1], [0, 0, 1, 1], [], []>} : vector<16x64xf32>, vector<64x32xf32>, vector<16x32xf32> -> vector<16x32xf32>
    %c0_37 = arith.constant 0 : index
    %c0_38 = arith.constant 0 : index
    %102 = vector.load %arg10[%c0_37, %c0_38] : memref<16x128xf32, #tpu.memory_space<vmem>>, vector<16x128xf32>
    %cst_39 = arith.constant 0.000000e+00 : f32
    %103 = vector.broadcast %cst_39 : f32 to vector<32x128xf32>
    %104 = vector.extract_strided_slice %84 {offsets = [0, 0], sizes = [1, 128], strides = [1, 1]} : vector<16x128xf32> to vector<1x128xf32>
    %105 = vector.broadcast %104 : vector<1x128xf32> to vector<16x128xf32>
    %106 = arith.mulf %105, %102 : vector<16x128xf32>
    %107 = vector.extract_strided_slice %84 {offsets = [1, 0], sizes = [1, 128], strides = [1, 1]} : vector<16x128xf32> to vector<1x128xf32>
    %108 = vector.broadcast %107 : vector<1x128xf32> to vector<16x128xf32>
    %109 = arith.mulf %108, %102 : vector<16x128xf32>
    %110 = tpu.concatenate %106, %109 in 0 : vector<16x128xf32>, vector<16x128xf32> -> vector<32x128xf32>
    %111 = math.exp %110 : vector<32x128xf32>
    %112 = vector.extract_strided_slice %95 {offsets = [0, 0], sizes = [1, 128], strides = [1, 1]} : vector<16x128xf32> to vector<1x128xf32>
    %113 = vector.extract_strided_slice %98 {offsets = [0, 0], sizes = [16, 1], strides = [1, 1]} : vector<16x16xf32> to vector<16x1xf32>
    %114 = vector.extract_strided_slice %112 {offsets = [0, 0], sizes = [1, 64], strides = [1, 1]} : vector<1x128xf32> to vector<1x64xf32>
    %115 = vector.broadcast %113 : vector<16x1xf32> to vector<16x64xf32>
    %116 = vector.broadcast %114 : vector<1x64xf32> to vector<16x64xf32>
    %117 = arith.mulf %115, %116 : vector<16x64xf32>
    %118 = vector.extract_strided_slice %99 {offsets = [0, 14], sizes = [16, 1], strides = [1, 1]} : vector<16x16xf32> to vector<16x1xf32>
    %119 = vector.extract_strided_slice %112 {offsets = [0, 64], sizes = [1, 64], strides = [1, 1]} : vector<1x128xf32> to vector<1x64xf32>
    %120 = vector.broadcast %118 : vector<16x1xf32> to vector<16x64xf32>
    %121 = vector.broadcast %119 : vector<1x64xf32> to vector<16x64xf32>
    %122 = arith.mulf %120, %121 : vector<16x64xf32>
    %123 = tpu.concatenate %117, %122 in 1 : vector<16x64xf32>, vector<16x64xf32> -> vector<16x128xf32>
    %124 = vector.extract_strided_slice %95 {offsets = [1, 0], sizes = [1, 128], strides = [1, 1]} : vector<16x128xf32> to vector<1x128xf32>
    %125 = vector.extract_strided_slice %98 {offsets = [0, 1], sizes = [16, 1], strides = [1, 1]} : vector<16x16xf32> to vector<16x1xf32>
    %126 = vector.extract_strided_slice %124 {offsets = [0, 0], sizes = [1, 64], strides = [1, 1]} : vector<1x128xf32> to vector<1x64xf32>
    %127 = vector.broadcast %125 : vector<16x1xf32> to vector<16x64xf32>
    %128 = vector.broadcast %126 : vector<1x64xf32> to vector<16x64xf32>
    %129 = arith.mulf %127, %128 : vector<16x64xf32>
    %130 = vector.extract_strided_slice %99 {offsets = [0, 15], sizes = [16, 1], strides = [1, 1]} : vector<16x16xf32> to vector<16x1xf32>
    %131 = vector.extract_strided_slice %124 {offsets = [0, 64], sizes = [1, 64], strides = [1, 1]} : vector<1x128xf32> to vector<1x64xf32>
    %132 = vector.broadcast %130 : vector<16x1xf32> to vector<16x64xf32>
    %133 = vector.broadcast %131 : vector<1x64xf32> to vector<16x64xf32>
    %134 = arith.mulf %132, %133 : vector<16x64xf32>
    %135 = tpu.concatenate %129, %134 in 1 : vector<16x64xf32>, vector<16x64xf32> -> vector<16x128xf32>
    %136 = tpu.concatenate %123, %135 in 0 : vector<16x128xf32>, vector<16x128xf32> -> vector<32x128xf32>
    %137 = arith.mulf %111, %103 : vector<32x128xf32>
    %138 = arith.addf %137, %136 : vector<32x128xf32>
    %139 = arith.truncf %138 : vector<32x128xf32> to vector<32x128xbf16>
    %140 = arith.extf %139 : vector<32x128xbf16> to vector<32x128xf32>
    %141 = arith.subf %138, %140 : vector<32x128xf32>
    %142 = arith.truncf %141 : vector<32x128xf32> to vector<32x128xbf16>
    %143 = vector.extract_strided_slice %84 {offsets = [2, 0], sizes = [1, 128], strides = [1, 1]} : vector<16x128xf32> to vector<1x128xf32>
    %144 = vector.broadcast %143 : vector<1x128xf32> to vector<16x128xf32>
    %145 = arith.mulf %144, %102 : vector<16x128xf32>
    %146 = vector.extract_strided_slice %84 {offsets = [3, 0], sizes = [1, 128], strides = [1, 1]} : vector<16x128xf32> to vector<1x128xf32>
    %147 = vector.broadcast %146 : vector<1x128xf32> to vector<16x128xf32>
    %148 = arith.mulf %147, %102 : vector<16x128xf32>
    %149 = tpu.concatenate %145, %148 in 0 : vector<16x128xf32>, vector<16x128xf32> -> vector<32x128xf32>
    %150 = math.exp %149 : vector<32x128xf32>
    %151 = vector.extract_strided_slice %95 {offsets = [2, 0], sizes = [1, 128], strides = [1, 1]} : vector<16x128xf32> to vector<1x128xf32>
    %152 = vector.extract_strided_slice %98 {offsets = [0, 2], sizes = [16, 1], strides = [1, 1]} : vector<16x16xf32> to vector<16x1xf32>
    %153 = vector.extract_strided_slice %151 {offsets = [0, 0], sizes = [1, 64], strides = [1, 1]} : vector<1x128xf32> to vector<1x64xf32>
    %154 = vector.broadcast %152 : vector<16x1xf32> to vector<16x64xf32>
    %155 = vector.broadcast %153 : vector<1x64xf32> to vector<16x64xf32>
    %156 = arith.mulf %154, %155 : vector<16x64xf32>
    %157 = vector.extract_strided_slice %99 {offsets = [0, 12], sizes = [16, 1], strides = [1, 1]} : vector<16x16xf32> to vector<16x1xf32>
    %158 = vector.extract_strided_slice %151 {offsets = [0, 64], sizes = [1, 64], strides = [1, 1]} : vector<1x128xf32> to vector<1x64xf32>
    %159 = vector.broadcast %157 : vector<16x1xf32> to vector<16x64xf32>
    %160 = vector.broadcast %158 : vector<1x64xf32> to vector<16x64xf32>
    %161 = arith.mulf %159, %160 : vector<16x64xf32>
    %162 = tpu.concatenate %156, %161 in 1 : vector<16x64xf32>, vector<16x64xf32> -> vector<16x128xf32>
    %163 = vector.extract_strided_slice %95 {offsets = [3, 0], sizes = [1, 128], strides = [1, 1]} : vector<16x128xf32> to vector<1x128xf32>
    %164 = vector.extract_strided_slice %98 {offsets = [0, 3], sizes = [16, 1], strides = [1, 1]} : vector<16x16xf32> to vector<16x1xf32>
    %165 = vector.extract_strided_slice %163 {offsets = [0, 0], sizes = [1, 64], strides = [1, 1]} : vector<1x128xf32> to vector<1x64xf32>
    %166 = vector.broadcast %164 : vector<16x1xf32> to vector<16x64xf32>
    %167 = vector.broadcast %165 : vector<1x64xf32> to vector<16x64xf32>
    %168 = arith.mulf %166, %167 : vector<16x64xf32>
    %169 = vector.extract_strided_slice %99 {offsets = [0, 13], sizes = [16, 1], strides = [1, 1]} : vector<16x16xf32> to vector<16x1xf32>
    %170 = vector.extract_strided_slice %163 {offsets = [0, 64], sizes = [1, 64], strides = [1, 1]} : vector<1x128xf32> to vector<1x64xf32>
    %171 = vector.broadcast %169 : vector<16x1xf32> to vector<16x64xf32>
    %172 = vector.broadcast %170 : vector<1x64xf32> to vector<16x64xf32>
    %173 = arith.mulf %171, %172 : vector<16x64xf32>
    %174 = tpu.concatenate %168, %173 in 1 : vector<16x64xf32>, vector<16x64xf32> -> vector<16x128xf32>
    %175 = tpu.concatenate %162, %174 in 0 : vector<16x128xf32>, vector<16x128xf32> -> vector<32x128xf32>
    %176 = arith.mulf %150, %138 : vector<32x128xf32>
    %177 = arith.addf %176, %175 : vector<32x128xf32>
    %178 = arith.truncf %177 : vector<32x128xf32> to vector<32x128xbf16>
    %179 = arith.extf %178 : vector<32x128xbf16> to vector<32x128xf32>
    %180 = arith.subf %177, %179 : vector<32x128xf32>
    %181 = arith.truncf %180 : vector<32x128xf32> to vector<32x128xbf16>
    %182 = vector.extract_strided_slice %84 {offsets = [4, 0], sizes = [1, 128], strides = [1, 1]} : vector<16x128xf32> to vector<1x128xf32>
    %183 = vector.broadcast %182 : vector<1x128xf32> to vector<16x128xf32>
    %184 = arith.mulf %183, %102 : vector<16x128xf32>
    %185 = vector.extract_strided_slice %84 {offsets = [5, 0], sizes = [1, 128], strides = [1, 1]} : vector<16x128xf32> to vector<1x128xf32>
    %186 = vector.broadcast %185 : vector<1x128xf32> to vector<16x128xf32>
    %187 = arith.mulf %186, %102 : vector<16x128xf32>
    %188 = tpu.concatenate %184, %187 in 0 : vector<16x128xf32>, vector<16x128xf32> -> vector<32x128xf32>
    %189 = math.exp %188 : vector<32x128xf32>
    %190 = vector.extract_strided_slice %95 {offsets = [4, 0], sizes = [1, 128], strides = [1, 1]} : vector<16x128xf32> to vector<1x128xf32>
    %191 = vector.extract_strided_slice %98 {offsets = [0, 4], sizes = [16, 1], strides = [1, 1]} : vector<16x16xf32> to vector<16x1xf32>
    %192 = vector.extract_strided_slice %190 {offsets = [0, 0], sizes = [1, 64], strides = [1, 1]} : vector<1x128xf32> to vector<1x64xf32>
    %193 = vector.broadcast %191 : vector<16x1xf32> to vector<16x64xf32>
    %194 = vector.broadcast %192 : vector<1x64xf32> to vector<16x64xf32>
    %195 = arith.mulf %193, %194 : vector<16x64xf32>
    %196 = vector.extract_strided_slice %99 {offsets = [0, 10], sizes = [16, 1], strides = [1, 1]} : vector<16x16xf32> to vector<16x1xf32>
    %197 = vector.extract_strided_slice %190 {offsets = [0, 64], sizes = [1, 64], strides = [1, 1]} : vector<1x128xf32> to vector<1x64xf32>
    %198 = vector.broadcast %196 : vector<16x1xf32> to vector<16x64xf32>
    %199 = vector.broadcast %197 : vector<1x64xf32> to vector<16x64xf32>
    %200 = arith.mulf %198, %199 : vector<16x64xf32>
    %201 = tpu.concatenate %195, %200 in 1 : vector<16x64xf32>, vector<16x64xf32> -> vector<16x128xf32>
    %202 = vector.extract_strided_slice %95 {offsets = [5, 0], sizes = [1, 128], strides = [1, 1]} : vector<16x128xf32> to vector<1x128xf32>
    %203 = vector.extract_strided_slice %98 {offsets = [0, 5], sizes = [16, 1], strides = [1, 1]} : vector<16x16xf32> to vector<16x1xf32>
    %204 = vector.extract_strided_slice %202 {offsets = [0, 0], sizes = [1, 64], strides = [1, 1]} : vector<1x128xf32> to vector<1x64xf32>
    %205 = vector.broadcast %203 : vector<16x1xf32> to vector<16x64xf32>
    %206 = vector.broadcast %204 : vector<1x64xf32> to vector<16x64xf32>
    %207 = arith.mulf %205, %206 : vector<16x64xf32>
    %208 = vector.extract_strided_slice %99 {offsets = [0, 11], sizes = [16, 1], strides = [1, 1]} : vector<16x16xf32> to vector<16x1xf32>
    %209 = vector.extract_strided_slice %202 {offsets = [0, 64], sizes = [1, 64], strides = [1, 1]} : vector<1x128xf32> to vector<1x64xf32>
    %210 = vector.broadcast %208 : vector<16x1xf32> to vector<16x64xf32>
    %211 = vector.broadcast %209 : vector<1x64xf32> to vector<16x64xf32>
    %212 = arith.mulf %210, %211 : vector<16x64xf32>
    %213 = tpu.concatenate %207, %212 in 1 : vector<16x64xf32>, vector<16x64xf32> -> vector<16x128xf32>
    %214 = tpu.concatenate %201, %213 in 0 : vector<16x128xf32>, vector<16x128xf32> -> vector<32x128xf32>
    %215 = arith.mulf %189, %177 : vector<32x128xf32>
    %216 = arith.addf %215, %214 : vector<32x128xf32>
    %217 = arith.truncf %216 : vector<32x128xf32> to vector<32x128xbf16>
    %218 = arith.extf %217 : vector<32x128xbf16> to vector<32x128xf32>
    %219 = arith.subf %216, %218 : vector<32x128xf32>
    %220 = arith.truncf %219 : vector<32x128xf32> to vector<32x128xbf16>
    %221 = vector.extract_strided_slice %84 {offsets = [6, 0], sizes = [1, 128], strides = [1, 1]} : vector<16x128xf32> to vector<1x128xf32>
    %222 = vector.broadcast %221 : vector<1x128xf32> to vector<16x128xf32>
    %223 = arith.mulf %222, %102 : vector<16x128xf32>
    %224 = vector.extract_strided_slice %84 {offsets = [7, 0], sizes = [1, 128], strides = [1, 1]} : vector<16x128xf32> to vector<1x128xf32>
    %225 = vector.broadcast %224 : vector<1x128xf32> to vector<16x128xf32>
    %226 = arith.mulf %225, %102 : vector<16x128xf32>
    %227 = tpu.concatenate %223, %226 in 0 : vector<16x128xf32>, vector<16x128xf32> -> vector<32x128xf32>
    %228 = math.exp %227 : vector<32x128xf32>
    %229 = vector.extract_strided_slice %95 {offsets = [6, 0], sizes = [1, 128], strides = [1, 1]} : vector<16x128xf32> to vector<1x128xf32>
    %230 = vector.extract_strided_slice %98 {offsets = [0, 6], sizes = [16, 1], strides = [1, 1]} : vector<16x16xf32> to vector<16x1xf32>
    %231 = vector.extract_strided_slice %229 {offsets = [0, 0], sizes = [1, 64], strides = [1, 1]} : vector<1x128xf32> to vector<1x64xf32>
    %232 = vector.broadcast %230 : vector<16x1xf32> to vector<16x64xf32>
    %233 = vector.broadcast %231 : vector<1x64xf32> to vector<16x64xf32>
    %234 = arith.mulf %232, %233 : vector<16x64xf32>
    %235 = vector.extract_strided_slice %99 {offsets = [0, 8], sizes = [16, 1], strides = [1, 1]} : vector<16x16xf32> to vector<16x1xf32>
    %236 = vector.extract_strided_slice %229 {offsets = [0, 64], sizes = [1, 64], strides = [1, 1]} : vector<1x128xf32> to vector<1x64xf32>
    %237 = vector.broadcast %235 : vector<16x1xf32> to vector<16x64xf32>
    %238 = vector.broadcast %236 : vector<1x64xf32> to vector<16x64xf32>
    %239 = arith.mulf %237, %238 : vector<16x64xf32>
    %240 = tpu.concatenate %234, %239 in 1 : vector<16x64xf32>, vector<16x64xf32> -> vector<16x128xf32>
    %241 = vector.extract_strided_slice %95 {offsets = [7, 0], sizes = [1, 128], strides = [1, 1]} : vector<16x128xf32> to vector<1x128xf32>
    %242 = vector.extract_strided_slice %98 {offsets = [0, 7], sizes = [16, 1], strides = [1, 1]} : vector<16x16xf32> to vector<16x1xf32>
    %243 = vector.extract_strided_slice %241 {offsets = [0, 0], sizes = [1, 64], strides = [1, 1]} : vector<1x128xf32> to vector<1x64xf32>
    %244 = vector.broadcast %242 : vector<16x1xf32> to vector<16x64xf32>
    %245 = vector.broadcast %243 : vector<1x64xf32> to vector<16x64xf32>
    %246 = arith.mulf %244, %245 : vector<16x64xf32>
    %247 = vector.extract_strided_slice %99 {offsets = [0, 9], sizes = [16, 1], strides = [1, 1]} : vector<16x16xf32> to vector<16x1xf32>
    %248 = vector.extract_strided_slice %241 {offsets = [0, 64], sizes = [1, 64], strides = [1, 1]} : vector<1x128xf32> to vector<1x64xf32>
    %249 = vector.broadcast %247 : vector<16x1xf32> to vector<16x64xf32>
    %250 = vector.broadcast %248 : vector<1x64xf32> to vector<16x64xf32>
    %251 = arith.mulf %249, %250 : vector<16x64xf32>
    %252 = tpu.concatenate %246, %251 in 1 : vector<16x64xf32>, vector<16x64xf32> -> vector<16x128xf32>
    %253 = tpu.concatenate %240, %252 in 0 : vector<16x128xf32>, vector<16x128xf32> -> vector<32x128xf32>
    %254 = arith.mulf %228, %216 : vector<32x128xf32>
    %255 = arith.addf %254, %253 : vector<32x128xf32>
    %256 = arith.truncf %255 : vector<32x128xf32> to vector<32x128xbf16>
    %257 = arith.extf %256 : vector<32x128xbf16> to vector<32x128xf32>
    %258 = arith.subf %255, %257 : vector<32x128xf32>
    %259 = arith.truncf %258 : vector<32x128xf32> to vector<32x128xbf16>
    %260 = vector.extract_strided_slice %84 {offsets = [8, 0], sizes = [1, 128], strides = [1, 1]} : vector<16x128xf32> to vector<1x128xf32>
    %261 = vector.broadcast %260 : vector<1x128xf32> to vector<16x128xf32>
    %262 = arith.mulf %261, %102 : vector<16x128xf32>
    %263 = vector.extract_strided_slice %84 {offsets = [9, 0], sizes = [1, 128], strides = [1, 1]} : vector<16x128xf32> to vector<1x128xf32>
    %264 = vector.broadcast %263 : vector<1x128xf32> to vector<16x128xf32>
    %265 = arith.mulf %264, %102 : vector<16x128xf32>
    %266 = tpu.concatenate %262, %265 in 0 : vector<16x128xf32>, vector<16x128xf32> -> vector<32x128xf32>
    %267 = math.exp %266 : vector<32x128xf32>
    %268 = vector.extract_strided_slice %95 {offsets = [8, 0], sizes = [1, 128], strides = [1, 1]} : vector<16x128xf32> to vector<1x128xf32>
    %269 = vector.extract_strided_slice %98 {offsets = [0, 8], sizes = [16, 1], strides = [1, 1]} : vector<16x16xf32> to vector<16x1xf32>
    %270 = vector.extract_strided_slice %268 {offsets = [0, 0], sizes = [1, 64], strides = [1, 1]} : vector<1x128xf32> to vector<1x64xf32>
    %271 = vector.broadcast %269 : vector<16x1xf32> to vector<16x64xf32>
    %272 = vector.broadcast %270 : vector<1x64xf32> to vector<16x64xf32>
    %273 = arith.mulf %271, %272 : vector<16x64xf32>
    %274 = vector.extract_strided_slice %99 {offsets = [0, 6], sizes = [16, 1], strides = [1, 1]} : vector<16x16xf32> to vector<16x1xf32>
    %275 = vector.extract_strided_slice %268 {offsets = [0, 64], sizes = [1, 64], strides = [1, 1]} : vector<1x128xf32> to vector<1x64xf32>
    %276 = vector.broadcast %274 : vector<16x1xf32> to vector<16x64xf32>
    %277 = vector.broadcast %275 : vector<1x64xf32> to vector<16x64xf32>
    %278 = arith.mulf %276, %277 : vector<16x64xf32>
    %279 = tpu.concatenate %273, %278 in 1 : vector<16x64xf32>, vector<16x64xf32> -> vector<16x128xf32>
    %280 = vector.extract_strided_slice %95 {offsets = [9, 0], sizes = [1, 128], strides = [1, 1]} : vector<16x128xf32> to vector<1x128xf32>
    %281 = vector.extract_strided_slice %98 {offsets = [0, 9], sizes = [16, 1], strides = [1, 1]} : vector<16x16xf32> to vector<16x1xf32>
    %282 = vector.extract_strided_slice %280 {offsets = [0, 0], sizes = [1, 64], strides = [1, 1]} : vector<1x128xf32> to vector<1x64xf32>
    %283 = vector.broadcast %281 : vector<16x1xf32> to vector<16x64xf32>
    %284 = vector.broadcast %282 : vector<1x64xf32> to vector<16x64xf32>
    %285 = arith.mulf %283, %284 : vector<16x64xf32>
    %286 = vector.extract_strided_slice %99 {offsets = [0, 7], sizes = [16, 1], strides = [1, 1]} : vector<16x16xf32> to vector<16x1xf32>
    %287 = vector.extract_strided_slice %280 {offsets = [0, 64], sizes = [1, 64], strides = [1, 1]} : vector<1x128xf32> to vector<1x64xf32>
    %288 = vector.broadcast %286 : vector<16x1xf32> to vector<16x64xf32>
    %289 = vector.broadcast %287 : vector<1x64xf32> to vector<16x64xf32>
    %290 = arith.mulf %288, %289 : vector<16x64xf32>
    %291 = tpu.concatenate %285, %290 in 1 : vector<16x64xf32>, vector<16x64xf32> -> vector<16x128xf32>
    %292 = tpu.concatenate %279, %291 in 0 : vector<16x128xf32>, vector<16x128xf32> -> vector<32x128xf32>
    %293 = arith.mulf %267, %255 : vector<32x128xf32>
    %294 = arith.addf %293, %292 : vector<32x128xf32>
    %295 = arith.truncf %294 : vector<32x128xf32> to vector<32x128xbf16>
    %296 = arith.extf %295 : vector<32x128xbf16> to vector<32x128xf32>
    %297 = arith.subf %294, %296 : vector<32x128xf32>
    %298 = arith.truncf %297 : vector<32x128xf32> to vector<32x128xbf16>
    %299 = vector.extract_strided_slice %84 {offsets = [10, 0], sizes = [1, 128], strides = [1, 1]} : vector<16x128xf32> to vector<1x128xf32>
    %300 = vector.broadcast %299 : vector<1x128xf32> to vector<16x128xf32>
    %301 = arith.mulf %300, %102 : vector<16x128xf32>
    %302 = vector.extract_strided_slice %84 {offsets = [11, 0], sizes = [1, 128], strides = [1, 1]} : vector<16x128xf32> to vector<1x128xf32>
    %303 = vector.broadcast %302 : vector<1x128xf32> to vector<16x128xf32>
    %304 = arith.mulf %303, %102 : vector<16x128xf32>
    %305 = tpu.concatenate %301, %304 in 0 : vector<16x128xf32>, vector<16x128xf32> -> vector<32x128xf32>
    %306 = math.exp %305 : vector<32x128xf32>
    %307 = vector.extract_strided_slice %95 {offsets = [10, 0], sizes = [1, 128], strides = [1, 1]} : vector<16x128xf32> to vector<1x128xf32>
    %308 = vector.extract_strided_slice %98 {offsets = [0, 10], sizes = [16, 1], strides = [1, 1]} : vector<16x16xf32> to vector<16x1xf32>
    %309 = vector.extract_strided_slice %307 {offsets = [0, 0], sizes = [1, 64], strides = [1, 1]} : vector<1x128xf32> to vector<1x64xf32>
    %310 = vector.broadcast %308 : vector<16x1xf32> to vector<16x64xf32>
    %311 = vector.broadcast %309 : vector<1x64xf32> to vector<16x64xf32>
    %312 = arith.mulf %310, %311 : vector<16x64xf32>
    %313 = vector.extract_strided_slice %99 {offsets = [0, 4], sizes = [16, 1], strides = [1, 1]} : vector<16x16xf32> to vector<16x1xf32>
    %314 = vector.extract_strided_slice %307 {offsets = [0, 64], sizes = [1, 64], strides = [1, 1]} : vector<1x128xf32> to vector<1x64xf32>
    %315 = vector.broadcast %313 : vector<16x1xf32> to vector<16x64xf32>
    %316 = vector.broadcast %314 : vector<1x64xf32> to vector<16x64xf32>
    %317 = arith.mulf %315, %316 : vector<16x64xf32>
    %318 = tpu.concatenate %312, %317 in 1 : vector<16x64xf32>, vector<16x64xf32> -> vector<16x128xf32>
    %319 = vector.extract_strided_slice %95 {offsets = [11, 0], sizes = [1, 128], strides = [1, 1]} : vector<16x128xf32> to vector<1x128xf32>
    %320 = vector.extract_strided_slice %98 {offsets = [0, 11], sizes = [16, 1], strides = [1, 1]} : vector<16x16xf32> to vector<16x1xf32>
    %321 = vector.extract_strided_slice %319 {offsets = [0, 0], sizes = [1, 64], strides = [1, 1]} : vector<1x128xf32> to vector<1x64xf32>
    %322 = vector.broadcast %320 : vector<16x1xf32> to vector<16x64xf32>
    %323 = vector.broadcast %321 : vector<1x64xf32> to vector<16x64xf32>
    %324 = arith.mulf %322, %323 : vector<16x64xf32>
    %325 = vector.extract_strided_slice %99 {offsets = [0, 5], sizes = [16, 1], strides = [1, 1]} : vector<16x16xf32> to vector<16x1xf32>
    %326 = vector.extract_strided_slice %319 {offsets = [0, 64], sizes = [1, 64], strides = [1, 1]} : vector<1x128xf32> to vector<1x64xf32>
    %327 = vector.broadcast %325 : vector<16x1xf32> to vector<16x64xf32>
    %328 = vector.broadcast %326 : vector<1x64xf32> to vector<16x64xf32>
    %329 = arith.mulf %327, %328 : vector<16x64xf32>
    %330 = tpu.concatenate %324, %329 in 1 : vector<16x64xf32>, vector<16x64xf32> -> vector<16x128xf32>
    %331 = tpu.concatenate %318, %330 in 0 : vector<16x128xf32>, vector<16x128xf32> -> vector<32x128xf32>
    %332 = arith.mulf %306, %294 : vector<32x128xf32>
    %333 = arith.addf %332, %331 : vector<32x128xf32>
    %334 = arith.truncf %333 : vector<32x128xf32> to vector<32x128xbf16>
    %335 = arith.extf %334 : vector<32x128xbf16> to vector<32x128xf32>
    %336 = arith.subf %333, %335 : vector<32x128xf32>
    %337 = arith.truncf %336 : vector<32x128xf32> to vector<32x128xbf16>
    %338 = vector.extract_strided_slice %84 {offsets = [12, 0], sizes = [1, 128], strides = [1, 1]} : vector<16x128xf32> to vector<1x128xf32>
    %339 = vector.broadcast %338 : vector<1x128xf32> to vector<16x128xf32>
    %340 = arith.mulf %339, %102 : vector<16x128xf32>
    %341 = vector.extract_strided_slice %84 {offsets = [13, 0], sizes = [1, 128], strides = [1, 1]} : vector<16x128xf32> to vector<1x128xf32>
    %342 = vector.broadcast %341 : vector<1x128xf32> to vector<16x128xf32>
    %343 = arith.mulf %342, %102 : vector<16x128xf32>
    %344 = tpu.concatenate %340, %343 in 0 : vector<16x128xf32>, vector<16x128xf32> -> vector<32x128xf32>
    %345 = math.exp %344 : vector<32x128xf32>
    %346 = vector.extract_strided_slice %95 {offsets = [12, 0], sizes = [1, 128], strides = [1, 1]} : vector<16x128xf32> to vector<1x128xf32>
    %347 = vector.extract_strided_slice %98 {offsets = [0, 12], sizes = [16, 1], strides = [1, 1]} : vector<16x16xf32> to vector<16x1xf32>
    %348 = vector.extract_strided_slice %346 {offsets = [0, 0], sizes = [1, 64], strides = [1, 1]} : vector<1x128xf32> to vector<1x64xf32>
    %349 = vector.broadcast %347 : vector<16x1xf32> to vector<16x64xf32>
    %350 = vector.broadcast %348 : vector<1x64xf32> to vector<16x64xf32>
    %351 = arith.mulf %349, %350 : vector<16x64xf32>
    %352 = vector.extract_strided_slice %99 {offsets = [0, 2], sizes = [16, 1], strides = [1, 1]} : vector<16x16xf32> to vector<16x1xf32>
    %353 = vector.extract_strided_slice %346 {offsets = [0, 64], sizes = [1, 64], strides = [1, 1]} : vector<1x128xf32> to vector<1x64xf32>
    %354 = vector.broadcast %352 : vector<16x1xf32> to vector<16x64xf32>
    %355 = vector.broadcast %353 : vector<1x64xf32> to vector<16x64xf32>
    %356 = arith.mulf %354, %355 : vector<16x64xf32>
    %357 = tpu.concatenate %351, %356 in 1 : vector<16x64xf32>, vector<16x64xf32> -> vector<16x128xf32>
    %358 = vector.extract_strided_slice %95 {offsets = [13, 0], sizes = [1, 128], strides = [1, 1]} : vector<16x128xf32> to vector<1x128xf32>
    %359 = vector.extract_strided_slice %98 {offsets = [0, 13], sizes = [16, 1], strides = [1, 1]} : vector<16x16xf32> to vector<16x1xf32>
    %360 = vector.extract_strided_slice %358 {offsets = [0, 0], sizes = [1, 64], strides = [1, 1]} : vector<1x128xf32> to vector<1x64xf32>
    %361 = vector.broadcast %359 : vector<16x1xf32> to vector<16x64xf32>
    %362 = vector.broadcast %360 : vector<1x64xf32> to vector<16x64xf32>
    %363 = arith.mulf %361, %362 : vector<16x64xf32>
    %364 = vector.extract_strided_slice %99 {offsets = [0, 3], sizes = [16, 1], strides = [1, 1]} : vector<16x16xf32> to vector<16x1xf32>
    %365 = vector.extract_strided_slice %358 {offsets = [0, 64], sizes = [1, 64], strides = [1, 1]} : vector<1x128xf32> to vector<1x64xf32>
    %366 = vector.broadcast %364 : vector<16x1xf32> to vector<16x64xf32>
    %367 = vector.broadcast %365 : vector<1x64xf32> to vector<16x64xf32>
    %368 = arith.mulf %366, %367 : vector<16x64xf32>
    %369 = tpu.concatenate %363, %368 in 1 : vector<16x64xf32>, vector<16x64xf32> -> vector<16x128xf32>
    %370 = tpu.concatenate %357, %369 in 0 : vector<16x128xf32>, vector<16x128xf32> -> vector<32x128xf32>
    %371 = arith.mulf %345, %333 : vector<32x128xf32>
    %372 = arith.addf %371, %370 : vector<32x128xf32>
    %373 = arith.truncf %372 : vector<32x128xf32> to vector<32x128xbf16>
    %374 = arith.extf %373 : vector<32x128xbf16> to vector<32x128xf32>
    %375 = arith.subf %372, %374 : vector<32x128xf32>
    %376 = arith.truncf %375 : vector<32x128xf32> to vector<32x128xbf16>
    %377 = vector.extract_strided_slice %84 {offsets = [14, 0], sizes = [1, 128], strides = [1, 1]} : vector<16x128xf32> to vector<1x128xf32>
    %378 = vector.broadcast %377 : vector<1x128xf32> to vector<16x128xf32>
    %379 = arith.mulf %378, %102 : vector<16x128xf32>
    %380 = vector.extract_strided_slice %84 {offsets = [15, 0], sizes = [1, 128], strides = [1, 1]} : vector<16x128xf32> to vector<1x128xf32>
    %381 = vector.broadcast %380 : vector<1x128xf32> to vector<16x128xf32>
    %382 = arith.mulf %381, %102 : vector<16x128xf32>
    %383 = tpu.concatenate %379, %382 in 0 : vector<16x128xf32>, vector<16x128xf32> -> vector<32x128xf32>
    %384 = math.exp %383 : vector<32x128xf32>
    %385 = vector.extract_strided_slice %95 {offsets = [14, 0], sizes = [1, 128], strides = [1, 1]} : vector<16x128xf32> to vector<1x128xf32>
    %386 = vector.extract_strided_slice %98 {offsets = [0, 14], sizes = [16, 1], strides = [1, 1]} : vector<16x16xf32> to vector<16x1xf32>
    %387 = vector.extract_strided_slice %385 {offsets = [0, 0], sizes = [1, 64], strides = [1, 1]} : vector<1x128xf32> to vector<1x64xf32>
    %388 = vector.broadcast %386 : vector<16x1xf32> to vector<16x64xf32>
    %389 = vector.broadcast %387 : vector<1x64xf32> to vector<16x64xf32>
    %390 = arith.mulf %388, %389 : vector<16x64xf32>
    %391 = vector.extract_strided_slice %99 {offsets = [0, 0], sizes = [16, 1], strides = [1, 1]} : vector<16x16xf32> to vector<16x1xf32>
    %392 = vector.extract_strided_slice %385 {offsets = [0, 64], sizes = [1, 64], strides = [1, 1]} : vector<1x128xf32> to vector<1x64xf32>
    %393 = vector.broadcast %391 : vector<16x1xf32> to vector<16x64xf32>
    %394 = vector.broadcast %392 : vector<1x64xf32> to vector<16x64xf32>
    %395 = arith.mulf %393, %394 : vector<16x64xf32>
    %396 = tpu.concatenate %390, %395 in 1 : vector<16x64xf32>, vector<16x64xf32> -> vector<16x128xf32>
    %397 = vector.extract_strided_slice %95 {offsets = [15, 0], sizes = [1, 128], strides = [1, 1]} : vector<16x128xf32> to vector<1x128xf32>
    %398 = vector.extract_strided_slice %98 {offsets = [0, 15], sizes = [16, 1], strides = [1, 1]} : vector<16x16xf32> to vector<16x1xf32>
    %399 = vector.extract_strided_slice %397 {offsets = [0, 0], sizes = [1, 64], strides = [1, 1]} : vector<1x128xf32> to vector<1x64xf32>
    %400 = vector.broadcast %398 : vector<16x1xf32> to vector<16x64xf32>
    %401 = vector.broadcast %399 : vector<1x64xf32> to vector<16x64xf32>
    %402 = arith.mulf %400, %401 : vector<16x64xf32>
    %403 = vector.extract_strided_slice %99 {offsets = [0, 1], sizes = [16, 1], strides = [1, 1]} : vector<16x16xf32> to vector<16x1xf32>
    %404 = vector.extract_strided_slice %397 {offsets = [0, 64], sizes = [1, 64], strides = [1, 1]} : vector<1x128xf32> to vector<1x64xf32>
    %405 = vector.broadcast %403 : vector<16x1xf32> to vector<16x64xf32>
    %406 = vector.broadcast %404 : vector<1x64xf32> to vector<16x64xf32>
    %407 = arith.mulf %405, %406 : vector<16x64xf32>
    %408 = tpu.concatenate %402, %407 in 1 : vector<16x64xf32>, vector<16x64xf32> -> vector<16x128xf32>
    %409 = tpu.concatenate %396, %408 in 0 : vector<16x128xf32>, vector<16x128xf32> -> vector<32x128xf32>
    %410 = arith.mulf %384, %372 : vector<32x128xf32>
    %411 = arith.addf %410, %409 : vector<32x128xf32>
    %412 = arith.truncf %411 : vector<32x128xf32> to vector<32x128xbf16>
    %413 = arith.extf %412 : vector<32x128xbf16> to vector<32x128xf32>
    %414 = arith.subf %411, %413 : vector<32x128xf32>
    %415 = arith.truncf %414 : vector<32x128xf32> to vector<32x128xbf16>
    %416 = tpu.concatenate %139, %178, %217, %256, %295, %334, %373, %412 in 0 : vector<32x128xbf16>, vector<32x128xbf16>, vector<32x128xbf16>, vector<32x128xbf16>, vector<32x128xbf16>, vector<32x128xbf16>, vector<32x128xbf16>, vector<32x128xbf16> -> vector<256x128xbf16>
    %417 = tpu.concatenate %142, %181, %220, %259, %298, %337, %376, %415 in 0 : vector<32x128xbf16>, vector<32x128xbf16>, vector<32x128xbf16>, vector<32x128xbf16>, vector<32x128xbf16>, vector<32x128xbf16>, vector<32x128xbf16>, vector<32x128xbf16> -> vector<256x128xbf16>
    %418 = vector.extract_strided_slice %101 {offsets = [0, 0], sizes = [16, 16], strides = [1, 1]} : vector<16x32xf32> to vector<16x16xf32>
    %419 = vector.extract_strided_slice %101 {offsets = [0, 16], sizes = [16, 16], strides = [1, 1]} : vector<16x32xf32> to vector<16x16xf32>
    %420 = tpu.concatenate %418, %419 in 0 : vector<16x16xf32>, vector<16x16xf32> -> vector<32x16xf32>
    %421 = arith.truncf %420 : vector<32x16xf32> to vector<32x16xbf16>
    %422 = arith.extf %421 : vector<32x16xbf16> to vector<32x16xf32>
    %423 = arith.subf %420, %422 : vector<32x16xf32>
    %424 = arith.truncf %423 : vector<32x16xf32> to vector<32x16xbf16>
    %c0_40 = arith.constant 0 : index
    %c0_41 = arith.constant 0 : index
    %425 = vector.load %arg14[%c0_40, %c0_41] : memref<16x256xbf16, #tpu.memory_space<vmem>>, vector<16x256xbf16>
    %c0_42 = arith.constant 0 : index
    %c0_43 = arith.constant 0 : index
    %426 = vector.load %arg15[%c0_42, %c0_43] : memref<32x256xf32, #tpu.memory_space<vmem>>, vector<32x256xf32>
    %cst_44 = arith.constant dense<0.000000e+00> : vector<32x256xf32>
    %427 = tpu.matmul %421, %425, %cst_44 {dimension_numbers = #tpu.dot_dimension_numbers<[1], [0], [0], [1], [0, 0, 1, 1], [], []>} : vector<32x16xbf16>, vector<16x256xbf16>, vector<32x256xf32> -> vector<32x256xf32>
    %428 = arith.mulf %427, %426 : vector<32x256xf32>
    %429 = arith.truncf %428 : vector<32x256xf32> to vector<32x256xbf16>
    %cst_45 = arith.constant dense<0.000000e+00> : vector<32x256xf32>
    %430 = tpu.matmul %424, %425, %cst_45 {dimension_numbers = #tpu.dot_dimension_numbers<[1], [0], [0], [1], [0, 0, 1, 1], [], []>} : vector<32x16xbf16>, vector<16x256xbf16>, vector<32x256xf32> -> vector<32x256xf32>
    %431 = arith.mulf %430, %426 : vector<32x256xf32>
    %432 = arith.truncf %431 : vector<32x256xf32> to vector<32x256xbf16>
    %cst_46 = arith.constant dense<0.000000e+00> : vector<32x128xf32>
    %433 = tpu.matmul %429, %416, %cst_46 {dimension_numbers = #tpu.dot_dimension_numbers<[1], [0], [0], [1], [0, 0, 1, 1], [], []>} : vector<32x256xbf16>, vector<256x128xbf16>, vector<32x128xf32> -> vector<32x128xf32>
    %cst_47 = arith.constant dense<0.000000e+00> : vector<32x128xf32>
    %434 = tpu.matmul %429, %417, %cst_47 {dimension_numbers = #tpu.dot_dimension_numbers<[1], [0], [0], [1], [0, 0, 1, 1], [], []>} : vector<32x256xbf16>, vector<256x128xbf16>, vector<32x128xf32> -> vector<32x128xf32>
    %435 = arith.addf %433, %434 : vector<32x128xf32>
    %cst_48 = arith.constant dense<0.000000e+00> : vector<32x128xf32>
    %436 = tpu.matmul %432, %416, %cst_48 {dimension_numbers = #tpu.dot_dimension_numbers<[1], [0], [0], [1], [0, 0, 1, 1], [], []>} : vector<32x256xbf16>, vector<256x128xbf16>, vector<32x128xf32> -> vector<32x128xf32>
    %437 = arith.addf %435, %436 : vector<32x128xf32>
    %438 = vector.extract_strided_slice %437 {offsets = [0, 0], sizes = [16, 64], strides = [1, 1]} : vector<32x128xf32> to vector<16x64xf32>
    %439 = vector.extract_strided_slice %437 {offsets = [16, 64], sizes = [16, 64], strides = [1, 1]} : vector<32x128xf32> to vector<16x64xf32>
    %440 = arith.addf %438, %439 : vector<16x64xf32>
    %c0_49 = arith.constant 0 : index
    %c0_50 = arith.constant 0 : index
    %441 = vector.load %arg11[%c0_49, %c0_50] : memref<1x64xf32, #tpu.memory_space<vmem>>, vector<1x64xf32>
    %442 = vector.broadcast %441 : vector<1x64xf32> to vector<16x64xf32>
    %443 = arith.mulf %60, %442 : vector<16x64xf32>
    %444 = arith.addf %440, %443 : vector<16x64xf32>
    %445 = arith.mulf %444, %444 : vector<16x64xf32>
    %cst_51 = arith.constant dense<0.000000e+00> : vector<16xf32>
    %446 = vector.multi_reduction <add>, %445, %cst_51 [1] : vector<16x64xf32> to vector<16xf32>
    %447 = vector.shape_cast %446 : vector<16xf32> to vector<16x1xf32>
    %cst_52 = arith.constant 6.400000e+01 : f32
    %448 = vector.broadcast %cst_52 : f32 to vector<16x1xf32>
    %449 = arith.divf %447, %448 : vector<16x1xf32>
    %cst_53 = arith.constant 9.99999974E-6 : f32
    %450 = vector.broadcast %cst_53 : f32 to vector<16x1xf32>
    %451 = arith.addf %449, %450 : vector<16x1xf32>
    %452 = math.rsqrt %451 : vector<16x1xf32>
    %453 = vector.broadcast %452 : vector<16x1xf32> to vector<16x64xf32>
    %454 = arith.mulf %444, %453 : vector<16x64xf32>
    %c0_54 = arith.constant 0 : index
    %c0_55 = arith.constant 0 : index
    %455 = vector.load %arg12[%c0_54, %c0_55] : memref<1x64xf32, #tpu.memory_space<vmem>>, vector<1x64xf32>
    %456 = vector.broadcast %455 : vector<1x64xf32> to vector<16x64xf32>
    %457 = arith.mulf %454, %456 : vector<16x64xf32>
    %cst_56 = arith.constant 0.000000e+00 : f32
    %458 = vector.broadcast %cst_56 : f32 to vector<16x64xf32>
    %459 = arith.subf %458, %26 : vector<16x64xf32>
    %460 = math.exp %459 : vector<16x64xf32>
    %cst_57 = arith.constant 1.000000e+00 : f32
    %461 = vector.broadcast %cst_57 : f32 to vector<16x64xf32>
    %462 = arith.addf %461, %460 : vector<16x64xf32>
    %cst_58 = arith.constant 1.000000e+00 : f32
    %463 = vector.broadcast %cst_58 : f32 to vector<16x64xf32>
    %464 = arith.divf %463, %462 : vector<16x64xf32>
    %465 = arith.mulf %26, %464 : vector<16x64xf32>
    %466 = arith.mulf %457, %465 : vector<16x64xf32>
    %c0_59 = arith.constant 0 : index
    %c0_60 = arith.constant 0 : index
    %467 = vector.load %arg13[%c0_59, %c0_60] : memref<64x32xf32, #tpu.memory_space<vmem>>, vector<64x32xf32>
    %cst_61 = arith.constant dense<0.000000e+00> : vector<16x32xf32>
    %468 = tpu.matmul %466, %467, %cst_61 {dimension_numbers = #tpu.dot_dimension_numbers<[1], [0], [0], [1], [0, 0, 1, 1], [], []>} : vector<16x64xf32>, vector<64x32xf32>, vector<16x32xf32> -> vector<16x32xf32>
    %c0_62 = arith.constant 0 : index
    %c0_63 = arith.constant 0 : index
    %469 = vector.load %arg16[%c0_62, %c0_63] : memref<16x32xf32, #tpu.memory_space<vmem>>, vector<16x32xf32>
    tpu.vector_store %arg16[%c0_62, %c0_63], %468 {strides = array<i32>} : memref<16x32xf32, #tpu.memory_space<vmem>>, vector<16x32xf32>,
    return
  }
}

</mosaic_0001>

<bundles_post_ra>
// kernel: tpu_custom_call.1
= control target key start
LH: loop header
LB: loop body
LE: loop exit
PB: predicated region body
PF: predicated region fallthrough
CT: control target
= control target key end

     0   :  { %s3534_s0 = inlined_call_operand.hbm [shape: f32[16,32], index: 0, kind: input, shape index: {}]   ;;  %s3535_s1 = inlined_call_operand.hbm [shape: f32[1,32], index: 1, kind: input, shape index: {}]   ;;  %s3536_s2 = inlined_call_operand.vmem [shape: f32[1,32], index: 2, kind: input, shape index: {}]   ;;  %s3537_s3 = inlined_call_operand.vmem [shape: f32[32,128], index: 3, kind: input, shape index: {}]   ;;  %s3538_s4 = inlined_call_operand.hbm [shape: f32[4,64], index: 4, kind: input, shape index: {}]   ;;  %s3539_s5 = inlined_call_operand.vmem [shape: f32[1,64], index: 5, kind: input, shape index: {}]   ;;  %s3540_s6 = inlined_call_operand.vmem [shape: f32[64,128], index: 6, kind: input, shape index: {}]   ;;  %s3541_s7 = inlined_call_operand.hbm [shape: f32[1,128], index: 7, kind: input, shape index: {}]   ;;  %s3542_s8 = inlined_call_operand.hbm [shape: f32[32,64], index: 8, kind: input, shape index: {}]   ;;  %s3543_s9 = inlined_call_operand.vmem [shape: f32[64,32], index: 9, kind: input, shape index: {}]   ;;  %s3544_s10 = inlined_call_operand.vmem [shape: f32[16,128], index: 10, kind: input, shape index: {}]   ;;  %s3545_s11 = inlined_call_operand.hbm [shape: f32[1,64], index: 11, kind: input, shape index: {}]   ;;  %s3546_s12 = inlined_call_operand.vmem [shape: f32[1,64], index: 12, kind: input, shape index: {}]   ;;  %s3547_s13 = inlined_call_operand.vmem [shape: f32[64,32], index: 13, kind: input, shape index: {}]   ;;  %s3548_s14 = inlined_call_operand.hbm [shape: bf16[16,256], index: 14, kind: input, shape index: {}]   ;;  %s3549_s15 = inlined_call_operand.vmem [shape: f32[32,256], index: 15, kind: input, shape index: {}]   ;;  %s3550_s16 = inlined_call_operand.hbm [shape: f32[16,32], index: 16, kind: output, shape index: {}]  }
   0x1   :  { %3571 = sst [smem:[#allocation38_spill]] %s3534_s0 }
   0x2   :  { %21 = vsyncpa [#allocation3], 0 }
   0x3   :  { %22 = vsyncpa [#allocation6], 0 }
   0x4   :  { %23 = vsyncpa [#allocation9], 0 }
   0x5   :  { %24 = vsyncpa [#allocation12], 0 }
   0x6   :  { %25 = vsyncpa [#allocation4], 0  ;;  %s2557_s21 = smov [#allocation5]   ;;  %s2558_s23 = smov [#allocation8]  }
   0x7   :  { %s44_s22 = sshll.u32 %s2557_s21, 4  ;;  %s72_s24 = sshll.u32 %s2558_s23, 4  ;;  %s45_s22 = int_to_ptr.vmem [resolvable:$true] %s44_s22  ;;  %s73_s24 = int_to_ptr.vmem [resolvable:$true] %s72_s24 }
   0x8   :  { %s2395_s25 = scalar_lea.vmem %s45_s22, 16  ;;  %s2399_s26 = scalar_lea.vmem %s45_s22, 32 }
   0x9   :  { %p2396_p0 = scmp.ne.s32.totalorder %s45_s22, %s2395_s25  ;;  %p2400_p1 = scmp.lt.s32.totalorder %s45_s22, %s45_s22 }
   0xa   :  { %p2401_p2 = scmp.lt.s32.totalorder %s2399_s26, %s2395_s25 }
   0xc   :  { %p2402_p3 = por %p2401_p2, %p2400_p1 }
   0xe   :  { %p2403_p4 = pnand %p2402_p3, %p2396_p0 }
  0x10   :  { %2406 = shalt.err (!%p2403_p4)
}
  0x11   :  { %47 = dma.hbm_to_vmem [thread:$0]  %s3535_s1, 16, %s45_s22, [#allocation6]  }
  0x12   :  { %s2415_s29 = scalar_lea.vmem %s73_s24, 16  ;;  %s2419_s30 = scalar_lea.vmem %s73_s24, 32 }
  0x13   :  { %p2416_p5 = scmp.ne.s32.totalorder %s73_s24, %s2415_s29  ;;  %p2420_p6 = scmp.lt.s32.totalorder %s73_s24, %s73_s24 }
  0x14   :  { %p2421_p7 = scmp.lt.s32.totalorder %s2419_s30, %s2415_s29 }
  0x16   :  { %p2422_p8 = por %p2421_p7, %p2420_p6 }
  0x18   :  { %p2423_p9 = pnand %p2422_p8, %p2416_p5 }
  0x1a   :  { %2426 = shalt.err (!%p2423_p9)
}
  0x1b   :  { %75 = dma.hbm_to_vmem [thread:$0]  %s3541_s7, 16, %s73_s24, [#allocation9]  }
  0x1c   :  { %s2559_s18 = smov [#allocation11]   ;;  %s2560_s20 = smov [#allocation2]  }
  0x1d   :  { %s98_s19 = sshll.u32 %s2559_s18, 4  ;;  %s31_s21 = sshll.u32 %s2560_s20, 4  ;;  %s99_s19 = int_to_ptr.vmem [resolvable:$true] %s98_s19  ;;  %s32_s21 = int_to_ptr.vmem [resolvable:$true] %s31_s21 }
  0x1e   :  { %s2435_s23 = scalar_lea.vmem %s99_s19, 16  ;;  %s2439_s1 = scalar_lea.vmem %s99_s19, 32 }
  0x1f   :  { %p2436_p10 = scmp.ne.s32.totalorder %s99_s19, %s2435_s23  ;;  %p2440_p11 = scmp.lt.s32.totalorder %s99_s19, %s99_s19 }
  0x20   :  { %p2441_p12 = scmp.lt.s32.totalorder %s2439_s1, %s2435_s23 }
  0x22   :  { %p2442_p13 = por %p2441_p12, %p2440_p11 }
  0x24   :  { %p2443_p0 = pnand %p2442_p13, %p2436_p10 }
  0x26   :  { %2446 = shalt.err (!%p2443_p0)
}
  0x27   :  { %101 = dma.hbm_to_vmem [thread:$0]  %s3545_s11, 16, %s99_s19, [#allocation12]  }
  0x28   :  { %s2455_s26 = scalar_lea.vmem %s32_s21, 256  ;;  %p2460_p2 = scmp.lt.s32.totalorder %s32_s21, %s32_s21 }
  0x29   :  { %p2456_p1 = scmp.ne.s32.totalorder %s32_s21, %s2455_s26  ;;  %p2461_p3 = scmp.lt.s32.totalorder %s2455_s26, %s2455_s26 }
  0x2b   :  { %p2462_p4 = por %p2461_p3, %p2460_p2 }
  0x2d   :  { %p2463_p5 = pnand %p2462_p4, %p2456_p1 }
  0x2f   :  { %2466 = shalt.err (!%p2463_p5)
}
  0x30   :  { %s2561_s7 = smov 128   ;;  %s2562_s24 = smov 8  }
  0x31   :  { %s3572_s29 = sld [smem:[#allocation38_spill]]  ;;  %s2563_s30 = smov [#allocation7]  }
  0x32   :  { %s58_s0 = sshll.u32 %s2563_s30, 4  ;;  %s2564_s17 = smov [#allocation10]   ;;  %s59_s0 = int_to_ptr.vmem [resolvable:$true] %s58_s0 }
  0x33   :  { %s81_s11 = sshll.u32 %s2564_s17, 4  ;;  %s2475_s18 = scalar_lea.vmem %s59_s0, 64  ;;  %s82_s11 = int_to_ptr.vmem [resolvable:$true] %s81_s11 }
  0x34   :  { %p2476_p6 = scmp.ne.s32.totalorder %s59_s0, %s2475_s18  ;;  %p2480_p7 = scmp.lt.s32.totalorder %s59_s0, %s59_s0 }
  0x35   :  { %p2481_p8 = scmp.lt.s32.totalorder %s2475_s18, %s2475_s18 }
  0x37   :  { %37 = dma.hbm_to_vmem [thread:$0]  %s3572_s29, 256, %s32_s21, [#allocation3], %s2561_s7, %s2561_s7, %s2562_s24  }
  0x38   :  { %p2482_p9 = por %p2481_p8, %p2480_p7 }
  0x3a   :  { %p2483_p10 = pnand %p2482_p9, %p2476_p6 }
  0x3c   :  { %2486 = shalt.err (!%p2483_p10)
}
  0x3d   :  { %61 = dma.hbm_to_vmem [thread:$0]  %s3538_s4, 64, %s59_s0, [#allocation6]  }
  0x3e   :  { %s2495_s23 = scalar_lea.vmem %s82_s11, 512  ;;  %p2500_p12 = scmp.lt.s32.totalorder %s82_s11, %s82_s11 }
  0x3f   :  { %p2496_p11 = scmp.ne.s32.totalorder %s82_s11, %s2495_s23  ;;  %p2501_p13 = scmp.lt.s32.totalorder %s2495_s23, %s2495_s23 }
  0x41   :  { %p2502_p0 = por %p2501_p13, %p2500_p12 }
  0x43   :  { %p2503_p1 = pnand %p2502_p0, %p2496_p11 }
  0x45   :  { %2506 = shalt.err (!%p2503_p1)
}
  0x46   :  { %87 = dma.hbm_to_vmem [thread:$0]  %s3542_s8, 512, %s82_s11, [#allocation9], %s2561_s7, %s2561_s7, %s2562_s24  }
  0x47   :  { %s2565_s22 = smov [#allocation13]  }
  0x48   :  { %s111_s25 = sshll.u32 %s2565_s22, 4  ;;  %s112_s25 = int_to_ptr.vmem [resolvable:$true] %s111_s25 }
  0x49   :  { %s2515_s26 = scalar_lea.vmem %s112_s25, 256  ;;  %p2520_p3 = scmp.lt.s32.totalorder %s112_s25, %s112_s25 }
  0x4a   :  { %p2516_p2 = scmp.ne.s32.totalorder %s112_s25, %s2515_s26  ;;  %p2521_p4 = scmp.lt.s32.totalorder %s2515_s26, %s2515_s26 }
  0x4c   :  { %p2522_p5 = por %p2521_p4, %p2520_p3 }
  0x4e   :  { %p2523_p6 = pnand %p2522_p5, %p2516_p2 }
  0x50   :  { %2526 = shalt.err (!%p2523_p6)
}
  0x51   :  { %117 = dma.hbm_to_vmem [thread:$0]  %s3548_s14, 256, %s112_s25, [#allocation12], %s2561_s7, %s2561_s7, %s2562_s24  }
  0x52   :  { %2547 = dma.done.wait [#allocation3], 256  }
  0x53   :  { %2548 = vsyncadd [#allocation3], 4294967040 }
  0x54   :  { %2549 = dma.done.wait [#allocation6], 80  }
  0x55   :  { %2550 = vsyncadd [#allocation6], 4294967216 }
  0x56   :  { %2551 = dma.done.wait [#allocation9], 528  }
  0x57   :  { %2552 = vsyncadd [#allocation9], 4294966768 }
  0x58   :  { %2553 = dma.done.wait [#allocation12], 272  }
  0x59   :  { %2554 = vsyncadd [#allocation12], 4294967024  ;;  %vm144_vm0 = vcmask 261120   ;;  %v142_v0 = vld [vmem:[#allocation2] sm:$0xff]  ;;  %v143_v1 = vld [vmem:[#allocation2 + $0x8] sm:$0xff]  ;;  %vm393_vm1 = vcmask 523264  }
  0x5a   :  { %v145_v2 = vsel %vm144_vm0, %v142_v0, 0.0  ;;  %v148_v3 = vsel %vm144_vm0, %v143_v1, 0.0  ;;  %v193_v14 = vld [vmem:[%s3537_s3 + $0x18] sm:$0xff]  ;;  %v192_v15 = vld [vmem:[%s3537_s3 + $0x10] sm:$0xff]  ;;  %v191_v16 = vld [vmem:[%s3537_s3 + $0x8] sm:$0xff]  ;;  %vm277_vm2 = vcmask 1045504  }
  0x5b   :  { %146 = vadd.xlane.f32.xlu0 %v145_v2  ;;  %2131 = vmatprep.subr.mxu0 %v193_v14  ;;  %v190_v17 = vld [vmem:[%s3537_s3] sm:$0xff]  ;;  %v1975_v25 = vld [vmem:[#allocation5] ss:$0 sm:$0xff]  ;;  %v385_v34 = vld [vmem:[%s3540_s6 + $0x38] sm:$0xff]  ;;  %vm333_vm3 = vcmask 1043456   ;;  %vm354_vm4 = vcmask 1041408  }
  0x5c   :  { %2132 = vmatpush3.msra.mxu0 %v193_v14  ;;  %v1976_v27 = vld [vmem:[%s3536_s2] ss:$0 sm:$0xff]  ;;  %2142 = vmatprep.subr.mxu1 %v385_v34  ;;  %v384_v35 = vld [vmem:[%s3540_s6 + $0x30] sm:$0xff]  ;;  %v383_v36 = vld [vmem:[%s3540_s6 + $0x28] sm:$0xff]  ;;  %s2566_s11 = smov 64   ;;  %vm1499_vm5 = vcmask 130048  }
  0x5d   :  { %2133 = vmatprep.subr.mxu0 %v192_v15  ;;  %2143 = vmatpush3.msra.mxu1 %v385_v34  ;;  %v382_v37 = vld [vmem:[%s3540_s6 + $0x20] sm:$0xff]  ;;  %v381_v38 = vld [vmem:[%s3540_s6 + $0x18] sm:$0xff]  ;;  %v380_v39 = vld [vmem:[%s3540_s6 + $0x10] sm:$0xff] }
  0x5e   :  { %2134 = vmatpush3.msra.mxu0 %v192_v15  ;;  %2144 = vmatprep.subr.mxu1 %v384_v35  ;;  %v379_v40 = vld [vmem:[%s3540_s6 + $0x8] sm:$0xff]  ;;  %v378_v41 = vld [vmem:[%s3540_s6] sm:$0xff]  ;;  %v533_v42 = vld [vmem:[#allocation10] sm:$0xff] }
  0x5f   :  { %149 = vadd.xlane.f32.xlu0 %v148_v3  ;;  %2135 = vmatprep.subr.mxu0 %v191_v16  ;;  %v1981_v44 = vld [vmem:[#allocation7 + $0x1] ss:$0 sm:$0xff]  ;;  %v1982_v46 = vld [vmem:[#allocation7 + $0x2] ss:$0 sm:$0xff]  ;;  %v1983_v49 = vld [vmem:[#allocation7 + $0x3] ss:$0 sm:$0xff] }
  0x60   :  { %2136 = vmatpush3.msra.mxu0 %v191_v16  ;;  %2145 = vmatpush3.msra.mxu1 %v384_v35  ;;  %v1980_v51 = vld [vmem:[#allocation7] ss:$0 sm:$0xff]  ;;  %v1979_v57 = vld [vmem:[%s3539_s5] ss:$0 sm:$0xff] }
  0x61   :  { %2137 = vmatprep.subr.mxu0 %v190_v17  ;;  %2146 = vmatprep.subr.mxu1 %v383_v36 }
  0x62   :  { %2138 = vmatpush3.msra.mxu0 %v190_v17  ;;  %2147 = vmatpush3.msra.mxu1 %v383_v36 }
  0x63   :  { %2148 = vmatprep.subr.mxu1 %v382_v37 }
  0x64   :  { %2149 = vmatpush3.msra.mxu1 %v382_v37 }
  0x65   :  { %2150 = vmatprep.subr.mxu1 %v381_v38 }
  0x66   :  { %2151 = vmatpush3.msra.mxu1 %v381_v38 }
  0x67   :  { %2152 = vmatprep.subr.mxu1 %v380_v39 }
  0x68   :  { %2153 = vmatpush3.msra.mxu1 %v380_v39 }
  0x69   :  { %2154 = vmatprep.subr.mxu1 %v379_v40 }
  0x6a   :  { %2155 = vmatpush3.msra.mxu1 %v379_v40  ;;  %v641_v40 = vld [vmem:[%s3543_s9 + $0x38] sm:$0xff] }
  0x6b   :  { %2156 = vmatprep.subr.mxu1 %v378_v41 }
  0x6c   :  { %2157 = vmatpush3.msra.mxu1 %v378_v41 }
  0xe4   :  { %v147_v4 = vpop.xlane.xlu0 %146 }
  0xe5   :  { %v152_v5 = vmul.f32 0.03125, %v147_v4 }
  0xe7   :  { %v154_v6 = vsub.f32 %v142_v0, %v152_v5 }
  0xe8   :  { %v150_v7 = vpop.xlane.xlu0 %149 }
  0xe9   :  { %v153_v8 = vmul.f32 0.03125, %v150_v7  ;;  %v156_v9 = vmul.f32 %v154_v6, %v154_v6 }
  0xeb   :  { %v155_v10 = vsub.f32 %v143_v1, %v153_v8  ;;  %v158_v11 = vsel %vm144_vm0, %v156_v9, 0.0 }
  0xec   :  { %159 = vadd.xlane.f32.xlu1 %v158_v11 }
  0xed   :  { %v157_v12 = vmul.f32 %v155_v10, %v155_v10 }
  0xef   :  { %v161_v13 = vsel %vm144_vm0, %v157_v12, 0.0 }
  0xf0   :  { %162 = vadd.xlane.f32.xlu1 %v161_v13 }
 0x175   :  { %v160_v18 = vpop.xlane.xlu1 %159 }
 0x176   :  { %v164_v19 = vmul.f32 0.03125, %v160_v18 }
 0x178   :  { %v166_v20 = vadd.f32 1e-05, %v164_v19 }
 0x179   :  { %v163_v21 = vpop.xlane.xlu1 %162 }
 0x17a   :  { %2290 = vrsqrt.f32 %v166_v20  ;;  %v165_v22 = vmul.f32 0.03125, %v163_v21 }
 0x17c   :  { %v167_v23 = vadd.f32 1e-05, %v165_v22 }
 0x17e   :  { %2292 = vrsqrt.f32 %v167_v23 }
 0x187   :  { %v2291_v24 = vpop.eup %2290 }
 0x188   :  { %v170_v26 = vmul.f32 %v2291_v24, %v154_v6 }
 0x18a   :  { %v179_v28 = vmul.f32 %v1975_v25, %v170_v26 }
 0x18b   :  { %v2293_v29 = vpop.eup %2292 }
 0x18c   :  { %v171_v30 = vmul.f32 %v2293_v29, %v155_v10  ;;  %v188_v31 = vadd.f32 %v1976_v27, %v179_v28 }
 0x18e   :  { %v180_v32 = vmul.f32 %v1975_v25, %v171_v30  ;;  %2139 = vmatprep.mubr.msk.f32.mxu0 %vm144_vm0, %v188_v31 }
 0x190   :  { %v189_v33 = vadd.f32 %v1976_v27, %v180_v32 }
 0x192   :  { %2140 = vmatmul.mubr.msk.f32.vlgmr.msra.gmra.mxu0 %vm144_vm0, %v189_v33 }
 0x193   :  { %2165 = vmatprep.mubr.msk.f32.mxu0 %vm393_vm1, %v533_v42  ;;  %v534_v42 = vld [vmem:[#allocation10 + $0x8] sm:$0xff] }
 0x252   :  { %v2746_v43 = vpop.f32.mrf.mxu0 }
 0x253   :  { %3573 = vst [vmem:[#allocation20_spill] sm:$0xff] %v2746_v43  ;;  %v279_v45 = vrot.slane %v2746_v43, 2 }
 0x254   :  { %v2749_v47 = vpop.f32.mrf.mxu0 }
 0x255   :  { %3574 = vst [vmem:[#allocation21_spill] sm:$0xff] %v2749_v47  ;;  %v309_v48 = vmul.f32 %v1981_v44, %v279_v45  ;;  %v278_v50 = vrot.slane %v2749_v47, 2  ;;  %v329_v52 = vmul.f32 %v1982_v46, %v279_v45  ;;  %v350_v54 = vmul.f32 %v1983_v49, %v279_v45 }
 0x257   :  { %v316_v53 = vrot.slane %v309_v48, 2  ;;  %v280_v55 = vsel %vm277_vm2, %v278_v50, %v279_v45  ;;  %v284_v56 = vsel %vm277_vm2, 0.0, %v278_v50  ;;  %v337_v6 = vrot.slane %v329_v52, 4  ;;  %v640_v45 = vld [vmem:[%s3543_s9 + $0x30] sm:$0xff]  ;;  %v639_v48 = vld [vmem:[%s3543_s9 + $0x28] sm:$0xff]  ;;  %v637_v50 = vld [vmem:[%s3543_s9 + $0x18] sm:$0xff] }
 0x258   :  { %v298_v58 = vmul.f32 %v1980_v51, %v284_v56  ;;  %v299_v59 = vmul.f32 %v1980_v51, %v280_v55  ;;  %v307_v60 = vmul.f32 %v1981_v44, %v284_v56  ;;  %v308_v61 = vmul.f32 %v1981_v44, %v280_v55  ;;  %v535_v44 = vld [vmem:[#allocation10 + $0x10] sm:$0xff]  ;;  %v636_v51 = vld [vmem:[%s3543_s9 + $0x10] sm:$0xff] }
 0x259   :  { %v327_v62 = vmul.f32 %v1982_v46, %v284_v56  ;;  %v328_v63 = vmul.f32 %v1982_v46, %v280_v55  ;;  %v348_v0 = vmul.f32 %v1983_v49, %v284_v56  ;;  %v349_v1 = vmul.f32 %v1983_v49, %v280_v55  ;;  %v536_v46 = vld [vmem:[#allocation10 + $0x18] sm:$0xff]  ;;  %v638_v49 = vld [vmem:[%s3543_s9 + $0x20] sm:$0xff]  ;;  %v635_v52 = vld [vmem:[%s3543_s9 + $0x8] sm:$0xff] }
 0x25a   :  { %v300_v2 = vadd.f32 %v1979_v57, %v298_v58  ;;  %v301_v3 = vadd.f32 %v1979_v57, %v299_v59  ;;  %v313_v4 = vrot.slane %v307_v60, 2  ;;  %v314_v5 = vrot.slane %v308_v61, 2  ;;  %v2289_v56 = vld [vmem:[#allocation13 + $0x4] ss:$8 sps:$4 sm:$0xff]   ;;  %v2287_v57 = vld [vmem:[#allocation13] ss:$8 sps:$4 sm:$0xff]  }
 0x25b   :  { %v334_v7 = vrot.slane %v327_v62, 4  ;;  %v335_v8 = vrot.slane %v328_v63, 4  ;;  %v355_v11 = vrot.slane %v348_v0, 6  ;;  %v356_v12 = vrot.slane %v349_v1, 6  ;;  %1520 = vmatprep.subr.bf16.mxu1 %v2289_v56 }
 0x25c   :  { %v315_v9 = vsel %vm277_vm2, %v313_v4, %v314_v5  ;;  %v317_v10 = vsel %vm277_vm2, %v314_v5, %v316_v53  ;;  %v358_v15 = vrot.slane %v350_v54, 6  ;;  %v634_v53 = vld [vmem:[%s3543_s9] sm:$0xff]  ;;  %v2567_v54 = vmov 1   ;;  %s2571_s9 = smov 112  }
 0x25d   :  { %v320_v13 = vadd.f32 %v315_v9, %v300_v2  ;;  %v321_v14 = vadd.f32 %v317_v10, %v301_v3  ;;  %v336_v16 = vsel %vm333_vm3, %v334_v7, %v335_v8  ;;  %v338_v17 = vsel %vm333_vm3, %v335_v8, %v337_v6  ;;  %2237 = vset.pattern.permute.xlu0 %v2567_v54 }
 0x25e   :  { %v357_v20 = vsel %vm354_vm4, %v355_v11, %v356_v12  ;;  %v359_v21 = vsel %vm354_vm4, %v356_v12, %v358_v15  ;;  %v3551_v55 = vmov 0   ;;  %v2569_v61 = vmov 15  }
 0x25f   :  { %v341_v18 = vadd.f32 %v336_v16, %v320_v13  ;;  %v342_v19 = vadd.f32 %v338_v17, %v321_v14  ;;  %2238 = vset.pattern.permute.xlu1 %v3551_v55  ;;  %v2570_v62 = vmov 14   ;;  %v2572_v8 = vmov 3   ;;  %v1984_v17 = vld [vmem:[#allocation8] ss:$0 sm:$0xff] }
 0x260   :  { %v2573_v9 = vmov 13   ;;  %v2574_v12 = vmov 2   ;;  %v2575_v14 = vmov 5  }
 0x261   :  { %v362_v22 = vadd.f32 %v357_v20, %v341_v18  ;;  %v363_v23 = vadd.f32 %v359_v21, %v342_v19  ;;  %v2576_v19 = vmov 9   ;;  %v2577_v21 = vmov 12  }
 0x263   :  { %v364_v24 = vsub.f32 0.0, %v362_v22  ;;  %v365_v25 = vsub.f32 0.0, %v363_v23 }
 0x265   :  { %v366_v26 = vmul.f32 1.442695, %v364_v24  ;;  %v368_v27 = vmul.f32 1.442695, %v365_v25 }
 0x267   :  { %2294 = vpow2.f32 %v366_v26  ;;  %v2579_v26 = vmov 6  }
 0x268   :  { %2296 = vpow2.f32 %v368_v27  ;;  %v2580_v27 = vmov 11  }
 0x274   :  { %v2295_v28 = vpop.eup %2294 }
 0x275   :  { %v2297_v29 = vpop.eup %2296  ;;  %v370_v30 = vadd.f32 1.0, %v2295_v28 }
 0x276   :  { %v371_v31 = vadd.f32 1.0, %v2297_v29 }
 0x277   :  { %2298 = vrcp.f32 %v370_v30  ;;  %v2581_v30 = vmov 4  }
 0x278   :  { %2300 = vrcp.f32 %v371_v31 }
 0x284   :  { %v2299_v32 = vpop.eup %2298 }
 0x285   :  { %v2301_v33 = vpop.eup %2300  ;;  %v2763_v34 = vmul.f32 %v2299_v32, %v362_v22  ;;  %v2582_v32 = vmov 10  }
 0x286   :  { %v2765_v35 = vmul.f32 %v2301_v33, %v363_v23  ;;  %v2578_v23 = vmov 7  }
 0x287   :  { %3575 = vst [vmem:[#allocation22_spill] sm:$0xff] %v2763_v34  ;;  %2158 = vmatprep.mubr.msk.f32.mxu1 %vm393_vm1, %v2763_v34  ;;  %v511_v10 = vrot.slane %v2763_v34, 6  ;;  %v513_v11 = vrot.slane %v2763_v34, 2 }
 0x288   :  { %3576 = vst [vmem:[#allocation23_spill] sm:$0xff] %v2765_v35  ;;  %2161 = vmatprep.subr.msk.mxu0 %vm393_vm1, %v2765_v35  ;;  %2159 = vmatmul.mubr.msk.f32.vlgmr.msra.gmra.mxu1 %vm393_vm1, %v2765_v35  ;;  %v507_v36 = vrot.slane %v2765_v35, 6  ;;  %v509_v37 = vrot.slane %v2765_v35, 2 }
 0x289   :  { %2162 = vmatpush3.xpose.msk.msra.mxu0 %vm393_vm1, %v2765_v35  ;;  %1538 = vmatprep.mubr.bf16.mxu1 %v3551_v55  ;;  %v518_v13 = vsel %vm354_vm4, %v511_v10, %v513_v11 }
 0x28a   :  { %2163 = vmatprep.subr.msk.mxu0 %vm393_vm1, %v2763_v34  ;;  %v515_v38 = vsel %vm354_vm4, %v507_v36, %v509_v37  ;;  %1521 = vmatpush1.bf16.msra.mxu1 %v2287_v57  ;;  %v519_v15 = vsel %vm333_vm3, %v518_v13, %v511_v10 }
 0x28b   :  { %v516_v39 = vsel %vm333_vm3, %v515_v38, %v507_v36  ;;  %v520_v18 = vsel %vm277_vm2, %v519_v15, %v513_v11 }
 0x28c   :  { %v517_v41 = vsel %vm277_vm2, %v516_v39, %v509_v37 }
 0x28d   :  { %2164 = vmatpush3.xpose.msk.msra.mxu0 %vm393_vm1, %v2763_v34  ;;  %523 = vrot.lane.b32.xlu1 %v517_v41, %s2566_s11 }
 0x28e   :  { %2171 = vmatprep.subr.mxu0 %v641_v40 }
 0x290   :  { %2166 = vmatmul.mubr.msk.f32.vlgmr.msra.gmra.mxu0 %vm393_vm1, %v534_v42  ;;  %v2583_v42 = vmov 8  }
 0x291   :  { %2172 = vmatpush3.msra.mxu0 %v641_v40  ;;  %2168 = vmatprep.mubr.msk.f32.mxu0 %vm393_vm1, %v535_v44 }
 0x292   :  { %2173 = vmatprep.subr.mxu0 %v640_v45 }
 0x293   :  { %2174 = vmatpush3.msra.mxu0 %v640_v45  ;;  %v719_v45 = vlaneseq }
 0x294   :  { %2169 = vmatmul.mubr.msk.f32.gmra.mxu0 %vm393_vm1, %v536_v46  ;;  %2175 = vmatprep.subr.mxu0 %v639_v48 }
 0x295   :  { %2176 = vmatpush3.msra.mxu0 %v639_v48  ;;  %2187 = vmatprep.mubr.msk.f32.mxu0 %vm393_vm1, %v2763_v34 }
 0x296   :  { %2177 = vmatprep.subr.mxu0 %v638_v49 }
 0x297   :  { %2178 = vmatpush3.msra.mxu0 %v638_v49 }
 0x298   :  { %2179 = vmatprep.subr.mxu0 %v637_v50 }
 0x299   :  { %2180 = vmatpush3.msra.mxu0 %v637_v50  ;;  %v2916_v50 = vshrl.u32 %v719_v45, 7 }
 0x29a   :  { %2181 = vmatprep.subr.mxu0 %v636_v51 }
 0x29b   :  { %2182 = vmatpush3.msra.mxu0 %v636_v51  ;;  %v2961_v11 = vsub.s32 3, %v2916_v50 }
 0x29c   :  { %2183 = vmatprep.subr.mxu0 %v635_v52 }
 0x29d   :  { %2184 = vmatpush3.msra.mxu0 %v635_v52 }
 0x29e   :  { %2185 = vmatprep.subr.mxu0 %v634_v53 }
 0x29f   :  { %2186 = vmatpush3.msra.mxu0 %v634_v53  ;;  %v2927_v53 = vsub.s32 1, %v2916_v50 }
 0x2a0   :  { %2188 = vmatmul.mubr.msk.f32.vlgmr.msra.gmra.mxu0 %vm393_vm1, %v2765_v35  ;;  %1591 = vmatprep.subr.bf16.mxu0 %v2289_v56 }
 0x2a1   :  { %1609 = vmatprep.mubr.bf16.mxu0 %v3551_v55  ;;  %1592 = vmatpush1.bf16.msra.mxu0 %v2287_v57 }
 0x348   :  { %v2160_v16 = vpop.f32.mrf.mxu1 }
 0x349   :  { %v472_v20 = vadd.f32 %v2160_v16, %v1984_v17 }
 0x34a   :  { %v466_v24 = vpop.f32.mrf.mxu1 }
 0x34b   :  { %v479_v22 = vmul.f32 1.442695, %v472_v20  ;;  %v2874_v25 = vadd.f32 %v1984_v17, %v466_v24  ;;  %vm476_vm6 = vcmp.le.f32.partialorder %v472_v20, 20.0 }
 0x34d   :  { %2302 = vpow2.f32 %v479_v22  ;;  %v477_v28 = vmul.f32 1.442695, %v2874_v25  ;;  %vm475_vm7 = vcmp.le.f32.partialorder %v2874_v25, 20.0 }
 0x34f   :  { %2304 = vpow2.f32 %v477_v28 }
 0x350   :  { %v2820_v58 = vpop.f32.mrf.mxu0 }
 0x351   :  { %774 = vperm.xlu0 %2237, %v2820_v58   ;;  %746 = vperm.xlu1 %2238, %v2820_v58  }
 0x352   :  { %v2824_v59 = vpop.f32.mrf.mxu0 }
 0x354   :  { %v2830_v60 = vpop.f32.mrf.mxu0 }
 0x355   :  { %2240 = vset.pattern.permute.xlu0 %v3551_v55  ;;  %2239 = vset.pattern.permute.xlu1 %v2567_v54 }
 0x356   :  { %741 = vperm.xlu0 %2240, %v2824_v59   ;;  %770 = vperm.xlu1 %2239, %v2824_v59   ;;  %v2835_v63 = vpop.f32.mrf.mxu0 }
 0x35a   :  { %2241 = vset.pattern.permute.xlu1 %v2569_v61  ;;  %2243 = vset.pattern.permute.xlu0 %v2570_v62  ;;  %v2303_v29 = vpop.eup %2302 }
 0x35b   :  { %788 = vperm.xlu1 %2241, %v2830_v60   ;;  %v482_v31 = vadd.f32 1.0, %v2303_v29 }
 0x35c   :  { %v2305_v33 = vpop.eup %2304 }
 0x35d   :  { %2306 = vlog2.f32 %v482_v31  ;;  %v481_v36 = vadd.f32 1.0, %v2305_v33 }
 0x35f   :  { %784 = vperm.xlu1 %2241, %v2835_v63   ;;  %2308 = vlog2.f32 %v481_v36 }
 0x360   :  { %v2189_v0 = vpop.f32.mrf.mxu0 }
 0x362   :  { %v708_v1 = vpop.f32.mrf.mxu0 }
 0x363   :  { %v1467_v2 = vpack.c.bf16 %v2189_v0, %v708_v1  ;;  %1461 = vrot.lane.b32.xlu0 %v708_v1, %s2571_s9  ;;  %2242 = vset.pattern.permute.xlu1 %v2570_v62 }
 0x364   :  { %757 = vperm.xlu1 %2242, %v2835_v63  }
 0x365   :  { %v1469_v3 = vunpack.c.l.bf16 %v1467_v2  ;;  %v1470_v4 = vunpack.c.h.bf16 %v1467_v2  ;;  %1997 = vmatmul.mubr.msk.bf16.vlgmr.msra.gmra.mxu1 %vm1499_vm5, %v1467_v2 }
 0x366   :  { %1548 = vmatprep.mubr.bf16.mxu1 %v3551_v55 }
 0x367   :  { %v1473_v5 = vsub.f32 %v708_v1, %v1469_v3  ;;  %v1474_v6 = vsub.f32 %v2189_v0, %v1470_v4  ;;  %762 = vperm.xlu0 %2243, %v2830_v60   ;;  %v2948_v1 = vld [vmem:[%s3544_s10] sm:$0xff]  ;;  %v2952_v3 = vsub.s32 0, %v2916_v50 }
 0x368   :  { %1463 = vrot.lane.b32.xlu1 %v2189_v0, %s2571_s9  ;;  %v2942_v0 = vld [vmem:[%s3544_s10 + $0x8] sm:$0xff] }
 0x369   :  { %v1477_v7 = vpack.c.bf16 %v1474_v6, %v1473_v5  ;;  %2244 = vset.pattern.permute.xlu1 %v2572_v8  ;;  %v524_v6 = vpop.permute.xlu1 %523 }
 0x36a   :  { %v2307_v37 = vpop.eup %2306 }
 0x36b   :  { %2245 = vset.pattern.permute.xlu0 %v2573_v9  ;;  %1999 = vmatmul.mubr.msk.bf16.vlgmr.msra.gmra.mxu0 %vm1499_vm5, %v1477_v7  ;;  %v486_v38 = vmul.f32 0.6931472, %v2307_v37 }
 0x36c   :  { %876 = vperm.xlu0 %2245, %v2835_v63   ;;  %862 = vperm.xlu1 %2244, %v2824_v59   ;;  %v2309_v46 = vpop.eup %2308 }
 0x36d   :  { %1619 = vmatprep.mubr.bf16.mxu0 %v3551_v55  ;;  %v2901_v39 = vsel %vm476_vm6, %v486_v38, %v472_v20  ;;  %v484_v49 = vmul.f32 0.6931472, %v2309_v46 }
 0x36e   :  { %v490_v40 = vrot.slane %v2901_v39, 6  ;;  %v492_v41 = vrot.slane %v2901_v39, 2 }
 0x36f   :  { %v2922_v52 = vsel %vm475_vm7, %v484_v49, %v2874_v25  ;;  %v2986_v49 = vsub.s32 2, %v2916_v50 }
 0x370   :  { %2248 = vset.pattern.permute.xlu0 %v2574_v12  ;;  %866 = vperm.xlu1 %2244, %v2820_v58   ;;  %v499_v44 = vsel %vm354_vm4, %v490_v40, %v492_v41 }
 0x371   :  { %840 = vperm.xlu0 %2248, %v2820_v58   ;;  %v500_v48 = vsel %vm333_vm3, %v499_v44, %v490_v40 }
 0x372   :  { %v501_v51 = vsel %vm277_vm2, %v500_v48, %v492_v41 }
 0x373   :  { %v2931_v56 = vsel %vm393_vm1, %v2922_v52, %v501_v51 }
 0x374   :  { %2246 = vset.pattern.permute.xlu1 %v2573_v9  ;;  %v728_v57 = vrot.slane %v2931_v56, %v2927_v53  ;;  %v722_v10 = vrot.slane %v2931_v56, %v2952_v3  ;;  %v824_v17 = vrot.slane %v2931_v56, %v2961_v11 }
 0x375   :  { %2250 = vset.pattern.permute.xlu0 %v2575_v14  ;;  %880 = vperm.xlu1 %2246, %v2830_v60  }
 0x376   :  { %954 = vperm.xlu0 %2250, %v2824_v59   ;;  %v730_v2 = vmul.f32 %v728_v57, %v2942_v0  ;;  %v729_v4 = vmul.f32 %v728_v57, %v2948_v1  ;;  %v724_v15 = vmul.f32 %v722_v10, %v2942_v0  ;;  %v723_v16 = vmul.f32 %v722_v10, %v2948_v1 }
 0x377   :  { %v825_v25 = vmul.f32 %v824_v17, %v2948_v1  ;;  %v826_v44 = vmul.f32 %v824_v17, %v2942_v0 }
 0x378   :  { %v737_v5 = vmul.f32 1.442695, %v730_v2  ;;  %v735_v7 = vmul.f32 1.442695, %v729_v4 }
 0x379   :  { %2247 = vset.pattern.permute.xlu1 %v2574_v12  ;;  %v831_v33 = vmul.f32 1.442695, %v825_v25 }
 0x37a   :  { %525 = vrot.lane.b32.xlu0 %v520_v18, %s2566_s11  ;;  %836 = vperm.xlu1 %2247, %v2824_v59   ;;  %2310 = vpow2.f32 %v737_v5  ;;  %v529_v18 = vsel %vm393_vm1, %v2763_v34, %v524_v6  ;;  %v833_v5 = vmul.f32 1.442695, %v826_v44 }
 0x37b   :  { %2259 = vset.pattern.permute.xlu0 %v2576_v19  ;;  %2312 = vpow2.f32 %v735_v7  ;;  %v2972_v20 = vmul.f32 %v529_v18, %v2931_v56 }
 0x37e   :  { %1138 = vperm.xlu0 %2259, %v2824_v59   ;;  %2249 = vset.pattern.permute.xlu1 %v2577_v21 }
 0x37f   :  { %850 = vperm.xlu1 %2249, %v2835_v63  }
 0x382   :  { %2260 = vset.pattern.permute.xlu0 %v2578_v23 }
 0x383   :  { %1050 = vperm.xlu0 %2260, %v2820_v58   ;;  %854 = vperm.xlu1 %2249, %v2830_v60  }
 0x387   :  { %1156 = vperm.xlu0 %2260, %v2830_v60   ;;  %2251 = vset.pattern.permute.xlu1 %v2575_v14  ;;  %v2311_v36 = vpop.eup %2310 }
 0x388   :  { %958 = vperm.xlu1 %2251, %v2820_v58   ;;  %v2313_v38 = vpop.eup %2312  ;;  %v798_v45 = vmul.f32 0.0, %v2311_v36 }
 0x389   :  { %v797_v46 = vmul.f32 0.0, %v2313_v38 }
 0x38b   :  { %2263 = vset.pattern.permute.xlu0 %v2579_v26 }
 0x38c   :  { %1024 = vperm.xlu0 %2263, %v2820_v58   ;;  %2252 = vset.pattern.permute.xlu1 %v2580_v27 }
 0x38d   :  { %968 = vperm.xlu1 %2252, %v2835_v63  }
 0x390   :  { %1126 = vperm.xlu0 %2263, %v2835_v63  }
 0x391   :  { %2253 = vset.pattern.permute.xlu1 %v2581_v30 }
 0x392   :  { %928 = vperm.xlu1 %2253, %v2824_v59  }
 0x394   :  { %2265 = vset.pattern.permute.xlu0 %v2580_v27 }
 0x395   :  { %972 = vperm.xlu0 %2265, %v2830_v60  }
 0x396   :  { %932 = vperm.xlu1 %2253, %v2820_v58  }
 0x399   :  { %1234 = vperm.xlu0 %2265, %v2820_v58  }
 0x39a   :  { %2254 = vset.pattern.permute.xlu1 %v2582_v32 }
 0x39b   :  { %946 = vperm.xlu1 %2254, %v2830_v60  }
 0x39d   :  { %2268 = vset.pattern.permute.xlu0 %v2582_v32 }
 0x39e   :  { %942 = vperm.xlu0 %2268, %v2835_v63  }
 0x39f   :  { %2255 = vset.pattern.permute.xlu1 %v2578_v23 }
 0x3a0   :  { %1046 = vperm.xlu1 %2255, %v2824_v59  }
 0x3a2   :  { %1204 = vperm.xlu0 %2268, %v2824_v59  }
 0x3a4   :  { %2256 = vset.pattern.permute.xlu1 %v2576_v19 }
 0x3a5   :  { %1060 = vperm.xlu1 %2256, %v2835_v63  }
 0x3a6   :  { %2272 = vset.pattern.permute.xlu0 %v2581_v30 }
 0x3a7   :  { %1222 = vperm.xlu0 %2272, %v2830_v60  }
 0x3a9   :  { %1064 = vperm.xlu1 %2256, %v2830_v60  }
 0x3ab   :  { %2274 = vset.pattern.permute.xlu0 %v2572_v8 }
 0x3ac   :  { %1336 = vperm.xlu0 %2274, %v2835_v63  }
 0x3ad   :  { %2257 = vset.pattern.permute.xlu1 %v2579_v26 }
 0x3ae   :  { %1020 = vperm.xlu1 %2257, %v2824_v59  }
 0x3b0   :  { %2277 = vset.pattern.permute.xlu0 %v2577_v21 }
 0x3b1   :  { %1300 = vperm.xlu0 %2277, %v2820_v58  }
 0x3b2   :  { %2258 = vset.pattern.permute.xlu1 %v2583_v42 }
 0x3b3   :  { %1034 = vperm.xlu1 %2258, %v2835_v63  }
 0x3b5   :  { %2279 = vset.pattern.permute.xlu0 %v2569_v61 }
 0x3b6   :  { %1414 = vperm.xlu0 %2279, %v2824_v59  }
 0x3b7   :  { %1038 = vperm.xlu1 %2258, %v2830_v60  }
 0x3ba   :  { %2282 = vset.pattern.permute.xlu0 %v2567_v54 }
 0x3bb   :  { %1432 = vperm.xlu0 %2282, %v2830_v60   ;;  %2261 = vset.pattern.permute.xlu1 %v2576_v19  ;;  %v733_v19 = vmul.f32 1.442695, %v724_v15 }
 0x3bc   :  { %1142 = vperm.xlu1 %2261, %v2820_v58  }
 0x3bd   :  { %2314 = vpow2.f32 %v733_v19 }
 0x3bf   :  { %2284 = vset.pattern.permute.xlu0 %v3551_v55 }
 0x3c0   :  { %1402 = vperm.xlu0 %2284, %v2835_v63   ;;  %2262 = vset.pattern.permute.xlu1 %v2578_v23  ;;  %v731_v23 = vmul.f32 1.442695, %v723_v16  ;;  %v818_v16 = vrot.slane %v2931_v56, %v2986_v49 }
 0x3c1   :  { %1152 = vperm.xlu1 %2262, %v2835_v63  }
 0x3c2   :  { %2316 = vpow2.f32 %v731_v23  ;;  %v819_v38 = vmul.f32 %v818_v16, %v2948_v1 }
 0x3c3   :  { %2318 = vpow2.f32 %v831_v33 }
 0x3c4   :  { %2286 = vset.pattern.permute.xlu0 %v2567_v54  ;;  %2320 = vpow2.f32 %v833_v5 }
 0x3c5   :  { %2264 = vset.pattern.permute.xlu1 %v2583_v42 }
 0x3c6   :  { %1112 = vperm.xlu1 %2264, %v2824_v59  }
 0x3ca   :  { %1116 = vperm.xlu1 %2264, %v2820_v58   ;;  %v2315_v15 = vpop.eup %2314 }
 0x3cc   :  { %v747_v13 = vpop.permute.xlu1 %746  ;;  %v775_v24 = vpop.permute.xlu0 %774 }
 0x3ce   :  { %2266 = vset.pattern.permute.xlu1 %v2579_v26  ;;  %v780_v26 = vrot.slane %v2972_v20, %v2927_v53 }
 0x3cf   :  { %1130 = vperm.xlu1 %2266, %v2830_v60   ;;  %v2317_v17 = vpop.eup %2316 }
 0x3d0   :  { %v782_v29 = vmul.f32 %v780_v26, %v775_v24  ;;  %v795_v33 = vmul.f32 0.0, %v2317_v17  ;;  %v827_v17 = vmul.f32 1.442695, %v819_v38 }
 0x3d1   :  { %v771_v22 = vpop.permute.xlu1 %770  ;;  %v742_v37 = vpop.permute.xlu0 %741 }
 0x3d2   :  { %v781_v41 = vmul.f32 %v780_v26, %v771_v22  ;;  %2322 = vpow2.f32 %v827_v17 }
 0x3d3   :  { %2267 = vset.pattern.permute.xlu1 %v2580_v27 }
 0x3d4   :  { %1230 = vperm.xlu1 %2267, %v2824_v59  }
 0x3d5   :  { %v1462_v51 = vpop.permute.xlu0 %1461 }
 0x3d6   :  { %v789_v28 = vpop.permute.xlu1 %788 }
 0x3d7   :  { %v792_v31 = vmul.f32 %v789_v28, %v780_v26  ;;  %v796_v28 = vmul.f32 0.0, %v2315_v15 }
 0x3d8   :  { %2269 = vset.pattern.permute.xlu1 %v2575_v14  ;;  %v752_v14 = vrot.slane %v2972_v20, %v2952_v3 }
 0x3d9   :  { %v794_v27 = vsel %vm393_vm1, %v782_v29, %v792_v31  ;;  %1244 = vperm.xlu1 %2269, %v2835_v63  }
 0x3da   :  { %v785_v40 = vpop.permute.xlu1 %784  ;;  %v2990_v57 = vadd.f32 %v798_v45, %v794_v27  ;;  %v753_v6 = vmul.f32 %v752_v14, %v742_v37  ;;  %v754_v24 = vmul.f32 %v752_v14, %v747_v13  ;;  %v872_v37 = vrot.slane %v2972_v20, %v2961_v11 }
 0x3db   :  { %v791_v42 = vmul.f32 %v785_v40, %v780_v26 }
 0x3dd   :  { %v793_v48 = vsel %vm393_vm1, %v781_v41, %v791_v42  ;;  %1248 = vperm.xlu1 %2269, %v2830_v60  }
 0x3de   :  { %v801_v2 = vadd.f32 %v797_v46, %v793_v48  ;;  %v2319_v46 = vpop.eup %2318 }
 0x3df   :  { %v758_v4 = vpop.permute.xlu1 %757 }
 0x3e0   :  { %v765_v7 = vmul.f32 %v758_v4, %v752_v14  ;;  %v2993_v10 = vpack.c.bf16 %v2990_v57, %v801_v2 }
 0x3e1   :  { %2270 = vset.pattern.permute.xlu1 %v2582_v32 }
 0x3e2   :  { %v767_v18 = vsel %vm393_vm1, %v753_v6, %v765_v7  ;;  %v763_v19 = vpop.permute.xlu0 %762  ;;  %1208 = vperm.xlu1 %2270, %v2820_v58   ;;  %v807_v22 = vunpack.c.l.bf16 %v2993_v10  ;;  %v808_v23 = vunpack.c.h.bf16 %v2993_v10  ;;  %v889_v6 = vmul.f32 %v2319_v46, %v801_v2 }
 0x3e3   :  { %v766_v25 = vmul.f32 %v763_v19, %v752_v14  ;;  %v1464_v26 = vpop.permute.xlu1 %1463  ;;  %v799_v42 = vadd.f32 %v795_v33, %v767_v18  ;;  %v820_v19 = vmul.f32 %v818_v16, %v2942_v0 }
 0x3e4   :  { %v1468_v29 = vpack.c.bf16 %v1464_v26, %v1462_v51  ;;  %v3002_v32 = vsub.f32 %v801_v2, %v807_v22  ;;  %v3005_v31 = vsub.f32 %v2990_v57, %v808_v23  ;;  %v3031_v2 = vsub.s32 5, %v2916_v50 }
 0x3e5   :  { %v768_v36 = vsel %vm393_vm1, %v754_v24, %v766_v25 }
 0x3e6   :  { %3577 = vst [vmem:[#allocation24_spill] sm:$0xff] %v3002_v32  ;;  %3578 = vst [vmem:[#allocation25_spill] sm:$0xff] %v3005_v31  ;;  %v3011_v27 = vadd.f32 %v796_v28, %v768_v36  ;;  %v1471_v13 = vunpack.c.l.bf16 %v1468_v29  ;;  %v1472_v40 = vunpack.c.h.bf16 %v1468_v29  ;;  %2271 = vset.pattern.permute.xlu1 %v2581_v30  ;;  %1998 = vmatmul.mubr.msk.bf16.gmra.mxu1 %vm1499_vm5, %v1468_v29  ;;  %v2321_v28 = vpop.eup %2320 }
 0x3e7   :  { %v877_v44 = vpop.permute.xlu0 %876  ;;  %1218 = vperm.xlu1 %2271, %v2835_v63   ;;  %v863_v45 = vpop.permute.xlu1 %862  ;;  %v916_v33 = vrot.slane %v2931_v56, %v3031_v2 }
 0x3e8   :  { %v1475_v48 = vsub.f32 %v1462_v51, %v1471_v13  ;;  %v1476_v14 = vsub.f32 %v1464_v26, %v1472_v40  ;;  %v883_v4 = vmul.f32 %v877_v44, %v872_v37  ;;  %v873_v5 = vmul.f32 %v872_v37, %v863_v45  ;;  %v2323_v17 = vpop.eup %2322 }
 0x3e9   :  { %v3019_v7 = vpack.c.bf16 %v3011_v27, %v799_v42  ;;  %v890_v40 = vmul.f32 %v2321_v28, %v2990_v57  ;;  %v917_v46 = vmul.f32 %v916_v33, %v2948_v1  ;;  %v918_v28 = vmul.f32 %v916_v33, %v2942_v0 }
 0x3ea   :  { %v1478_v30 = vpack.c.bf16 %v1476_v14, %v1475_v48  ;;  %v885_v15 = vsel %vm393_vm1, %v873_v5, %v883_v4 }
 0x3eb   :  { %3579 = vst [vmem:[#allocation26_spill] sm:$0xff] %v3019_v7  ;;  %v3023_v18 = vadd.f32 %v889_v6, %v885_v15  ;;  %2273 = vset.pattern.permute.xlu1 %v2573_v9  ;;  %v867_v22 = vpop.permute.xlu1 %866  ;;  %v805_v51 = vunpack.c.l.bf16 %v3019_v7  ;;  %v806_v23 = vunpack.c.h.bf16 %v3019_v7  ;;  %v829_v9 = vmul.f32 1.442695, %v820_v19 }
 0x3ec   :  { %v841_v24 = vpop.permute.xlu0 %840  ;;  %1322 = vperm.xlu1 %2273, %v2824_v59   ;;  %2000 = vmatmul.mubr.msk.bf16.gmra.mxu0 %vm1499_vm5, %v1478_v30  ;;  %v874_v36 = vmul.f32 %v872_v37, %v867_v22  ;;  %v923_v4 = vmul.f32 1.442695, %v917_v46  ;;  %v846_v6 = vrot.slane %v2972_v20, %v2986_v49  ;;  %v3067_v15 = vsub.s32 4, %v2916_v50 }
 0x3ed   :  { %v3033_v25 = vsub.f32 %v799_v42, %v805_v51  ;;  %v3036_v16 = vsub.f32 %v3011_v27, %v806_v23  ;;  %2324 = vpow2.f32 %v829_v9  ;;  %v887_v9 = vmul.f32 %v2323_v17, %v799_v42 }
 0x3ee   :  { %2326 = vpow2.f32 %v923_v4  ;;  %v848_v42 = vmul.f32 %v846_v6, %v841_v24  ;;  %v925_v4 = vmul.f32 1.442695, %v918_v28  ;;  %v964_v28 = vrot.slane %v2972_v20, %v3031_v2 }
 0x3ef   :  { %3580 = vst [vmem:[#allocation27_spill] sm:$0xff] %v3033_v25  ;;  %3581 = vst [vmem:[#allocation28_spill] sm:$0xff] %v3036_v16 }
 0x3f0   :  { %1326 = vperm.xlu1 %2273, %v2820_v58   ;;  %v881_v29 = vpop.permute.xlu1 %880  ;;  %2328 = vpow2.f32 %v925_v4 }
 0x3f1   :  { %v884_v38 = vmul.f32 %v881_v29, %v872_v37  ;;  %v3043_v13 = vpop.permute.xlu0 %954 }
 0x3f3   :  { %v886_v44 = vsel %vm393_vm1, %v874_v36, %v884_v38 }
 0x3f4   :  { %v3047_v45 = vadd.f32 %v890_v40, %v886_v44  ;;  %2275 = vset.pattern.permute.xlu1 %v2572_v8  ;;  %v910_v44 = vrot.slane %v2931_v56, %v3067_v15 }
 0x3f5   :  { %v3051_v48 = vpop.permute.xlu0 %525  ;;  %1340 = vperm.xlu1 %2275, %v2830_v60   ;;  %v837_v14 = vpop.permute.xlu1 %836 }
 0x3f6   :  { %v3056_v37 = vpack.c.bf16 %v3047_v45, %v3023_v18  ;;  %v847_v19 = vmul.f32 %v846_v6, %v837_v14  ;;  %v912_v17 = vmul.f32 %v910_v44, %v2942_v0 }
 0x3f8   :  { %v899_v57 = vunpack.c.l.bf16 %v3056_v37  ;;  %v900_v5 = vunpack.c.h.bf16 %v3056_v37 }
 0x3f9   :  { %v3062_v8 = vpop.permute.xlu0 %1138  ;;  %2276 = vset.pattern.permute.xlu1 %v2577_v21 }
 0x3fa   :  { %1296 = vperm.xlu1 %2276, %v2824_v59   ;;  %v851_v30 = vpop.permute.xlu1 %850  ;;  %v3070_v51 = vsub.f32 %v3023_v18, %v899_v57  ;;  %v3073_v23 = vsub.f32 %v3047_v45, %v900_v5  ;;  %v2325_v46 = vpop.eup %2324 }
 0x3fb   :  { %v857_v22 = vmul.f32 %v851_v30, %v846_v6  ;;  %v888_v33 = vmul.f32 %v2325_v46, %v3011_v27  ;;  %v911_v27 = vmul.f32 %v910_v44, %v2948_v1 }
 0x3fd   :  { %v859_v21 = vsel %vm393_vm1, %v847_v19, %v857_v22  ;;  %v3094_v19 = vsub.s32 7, %v2916_v50 }
 0x3fe   :  { %v3079_v36 = vadd.f32 %v887_v9, %v859_v21  ;;  %v3081_v38 = vpop.permute.xlu0 %1050  ;;  %2278 = vset.pattern.permute.xlu1 %v2574_v12  ;;  %v855_v40 = vpop.permute.xlu1 %854 }
 0x3ff   :  { %v858_v14 = vmul.f32 %v855_v40, %v846_v6  ;;  %1310 = vperm.xlu1 %2278, %v2835_v63   ;;  %v921_v6 = vmul.f32 1.442695, %v912_v17  ;;  %v1008_v40 = vrot.slane %v2931_v56, %v3094_v19 }
 0x401   :  { %v860_v57 = vsel %vm393_vm1, %v848_v42, %v858_v14  ;;  %v2327_v14 = vpop.eup %2326  ;;  %2330 = vpow2.f32 %v921_v6  ;;  %v1010_v6 = vmul.f32 %v1008_v40, %v2942_v0 }
 0x402   :  { %v892_v5 = vadd.f32 %v888_v33, %v860_v57  ;;  %v3089_v30 = vpop.permute.xlu0 %1156  ;;  %v965_v33 = vmul.f32 %v964_v28, %v3043_v13  ;;  %v919_v57 = vmul.f32 1.442695, %v911_v27  ;;  %v981_v17 = vmul.f32 %v2327_v14, %v3023_v18 }
 0x403   :  { %1314 = vperm.xlu1 %2278, %v2830_v60   ;;  %v959_v12 = vpop.permute.xlu1 %958  ;;  %v3129_v14 = vsub.s32 6, %v2916_v50  ;;  %v1017_v50 = vmul.f32 1.442695, %v1010_v6 }
 0x404   :  { %v3097_v24 = vpack.c.bf16 %v892_v5, %v3079_v36  ;;  %2332 = vpow2.f32 %v919_v57 }
 0x406   :  { %v897_v22 = vunpack.c.l.bf16 %v3097_v24  ;;  %v898_v9 = vunpack.c.h.bf16 %v3097_v24 }
 0x407   :  { %v3104_v21 = vpop.permute.xlu0 %1024  ;;  %2280 = vset.pattern.permute.xlu1 %v2569_v61 }
 0x408   :  { %1418 = vperm.xlu1 %2280, %v2820_v58   ;;  %v969_v46 = vpop.permute.xlu1 %968  ;;  %v3111_v44 = vsub.f32 %v3079_v36, %v897_v22  ;;  %v3113_v42 = vsub.f32 %v892_v5, %v898_v9  ;;  %v1009_v22 = vmul.f32 %v1008_v40, %v2948_v1  ;;  %v2329_v9 = vpop.eup %2328 }
 0x409   :  { %v975_v4 = vmul.f32 %v969_v46, %v964_v28  ;;  %v966_v46 = vmul.f32 %v964_v28, %v959_v12  ;;  %v1002_v12 = vrot.slane %v2931_v56, %v3129_v14 }
 0x40a   :  { %v1015_v18 = vmul.f32 1.442695, %v1009_v22 }
 0x40b   :  { %v977_v26 = vsel %vm393_vm1, %v965_v33, %v975_v4  ;;  %v3120_v41 = vpop.permute.xlu0 %1126  ;;  %v497_v4 = vrot.slane %v2922_v52, 2 }
 0x40c   :  { %v3122_v29 = vadd.f32 %v981_v17, %v977_v26  ;;  %2281 = vset.pattern.permute.xlu1 %v2567_v54  ;;  %v495_v54 = vrot.slane %v2922_v52, 6  ;;  %2334 = vpow2.f32 %v1015_v18 }
 0x40d   :  { %1428 = vperm.xlu1 %2281, %v2835_v63   ;;  %v929_v13 = vpop.permute.xlu1 %928  ;;  %v982_v63 = vmul.f32 %v2329_v9, %v3047_v45  ;;  %2336 = vpow2.f32 %v1017_v50 }
 0x40e   :  { %v2331_v45 = vpop.eup %2330 }
 0x40f   :  { %v980_v9 = vmul.f32 %v2331_v45, %v892_v5 }
 0x410   :  { %v973_v27 = vpop.permute.xlu0 %972 }
 0x411   :  { %v976_v33 = vmul.f32 %v973_v27, %v964_v28  ;;  %2283 = vset.pattern.permute.xlu1 %v2570_v62  ;;  %v933_v26 = vpop.permute.xlu1 %932  ;;  %v938_v62 = vrot.slane %v2972_v20, %v3067_v15  ;;  %v502_v28 = vsel %vm354_vm4, %v495_v54, %v497_v4 }
 0x412   :  { %1388 = vperm.xlu1 %2283, %v2824_v59   ;;  %v503_v6 = vsel %vm333_vm3, %v502_v28, %v495_v54 }
 0x413   :  { %v978_v57 = vsel %vm393_vm1, %v966_v46, %v976_v33  ;;  %v940_v22 = vmul.f32 %v938_v62, %v933_v26  ;;  %v939_v46 = vmul.f32 %v938_v62, %v929_v13  ;;  %v3582_v26 = vmov 0  }
 0x414   :  { %v986_v40 = vadd.f32 %v982_v63, %v978_v57  ;;  %v3137_v17 = vpop.permute.xlu0 %1234  ;;  %v2333_v57 = vpop.eup %2332  ;;  %v504_v45 = vsel %vm277_vm2, %v503_v6, %v497_v4 }
 0x416   :  { %1392 = vperm.xlu1 %2283, %v2820_v58   ;;  %v947_v52 = vpop.permute.xlu1 %946  ;;  %v3146_v59 = vpack.c.bf16 %v986_v40, %v3122_v29  ;;  %v1003_v58 = vmul.f32 %v1002_v12, %v2948_v1 }
 0x417   :  { %v950_v27 = vmul.f32 %v947_v52, %v938_v62  ;;  %v979_v52 = vmul.f32 %v2333_v57, %v3079_v36 }
 0x418   :  { %v991_v18 = vunpack.c.l.bf16 %v3146_v59  ;;  %v992_v56 = vunpack.c.h.bf16 %v3146_v59 }
 0x419   :  { %v952_v33 = vsel %vm393_vm1, %v940_v22, %v950_v27  ;;  %v943_v63 = vpop.permute.xlu0 %942  ;;  %v1011_v22 = vmul.f32 1.442695, %v1003_v58  ;;  %v1004_v27 = vmul.f32 %v1002_v12, %v2942_v0 }
 0x41a   :  { %v3153_v61 = vadd.f32 %v980_v9, %v952_v33  ;;  %v949_v55 = vmul.f32 %v943_v63, %v938_v62  ;;  %2285 = vset.pattern.permute.xlu1 %v3582_v26  ;;  %v3157_v5 = vsub.f32 %v3122_v29, %v991_v18  ;;  %v3159_v50 = vsub.f32 %v986_v40, %v992_v56  ;;  %v2335_v18 = vpop.eup %2334 }
 0x41b   :  { %1406 = vperm.xlu1 %2285, %v2830_v60   ;;  %v1047_v13 = vpop.permute.xlu1 %1046  ;;  %v1056_v9 = vrot.slane %v2972_v20, %v3094_v19  ;;  %v1073_v12 = vmul.f32 %v2335_v18, %v3122_v29  ;;  %2338 = vpow2.f32 %v1011_v22  ;;  %v1013_v33 = vmul.f32 1.442695, %v1004_v27  ;;  %v3201_v18 = vld [vmem:[%s3549_s15] sm:$0xff] }
 0x41c   :  { %v951_v54 = vsel %vm393_vm1, %v939_v46, %v949_v55  ;;  %v3178_v55 = vsel %vm393_vm1, %v2901_v39, %v504_v45  ;;  %3583 = vst [vmem:[#allocation29_spill] sm:$0xff] %v3201_v18 }
 0x41d   :  { %v3167_v62 = vadd.f32 %v979_v52, %v951_v54  ;;  %v1057_v56 = vmul.f32 %v1056_v9, %v1047_v13  ;;  %v1100_v63 = vrot.slane %v3178_v55, %v2927_v53  ;;  %v2337_v13 = vpop.eup %2336  ;;  %v1058_v54 = vmul.f32 %v1056_v9, %v3081_v38 }
 0x41e   :  { %v1074_v27 = vmul.f32 %v2337_v13, %v986_v40  ;;  %2340 = vpow2.f32 %v1013_v33  ;;  %v1482_v40 = vld [vmem:[%s3549_s15 + $0x8] sm:$0xff]  ;;  %v1484_v33 = vld [vmem:[%s3549_s15 + $0x18] sm:$0xff] }
 0x41f   :  { %v3174_v36 = vpack.c.bf16 %v3153_v61, %v3167_v62  ;;  %v1102_v38 = vmul.f32 %v1100_v63, %v2942_v0 }
 0x420   :  { %v1061_v60 = vpop.permute.xlu1 %1060 }
 0x421   :  { %v1067_v4 = vmul.f32 %v1061_v60, %v1056_v9  ;;  %v989_v6 = vunpack.c.l.bf16 %v3174_v36  ;;  %v990_v46 = vunpack.c.h.bf16 %v3174_v36 }
 0x423   :  { %v1069_v58 = vsel %vm393_vm1, %v1057_v56, %v1067_v4  ;;  %v3187_v39 = vsub.f32 %v3167_v62, %v989_v6  ;;  %v3190_v57 = vsub.f32 %v3153_v61, %v990_v46  ;;  %v3206_v4 = vld [vmem:[%s3549_s15 + $0x10] sm:$0xff] }
 0x424   :  { %v3192_v26 = vadd.f32 %v1073_v12, %v1069_v58  ;;  %v1065_v52 = vpop.permute.xlu1 %1064  ;;  %3584 = vst [vmem:[#allocation30_spill] sm:$0xff] %v3206_v4 }
 0x425   :  { %v1068_v29 = vmul.f32 %v1065_v52, %v1056_v9  ;;  %v1540_v45 = vpop.f32.mrf.mxu1  ;;  %v1101_v9 = vmul.f32 %v1100_v63, %v2948_v1 }
 0x426   :  { %v1559_v58 = vmul.f32 %v1540_v45, %v3201_v18  ;;  %v1030_v45 = vrot.slane %v2972_v20, %v3129_v14  ;;  %v530_v20 = vsel %vm393_vm1, %v2765_v35, %v3051_v48 }
 0x427   :  { %v1070_v60 = vsel %vm393_vm1, %v1058_v54, %v1068_v29  ;;  %v1542_v56 = vpop.f32.mrf.mxu1  ;;  %v1109_v29 = vmul.f32 1.442695, %v1102_v38 }
 0x428   :  { %v3210_v6 = vadd.f32 %v1074_v27, %v1070_v60  ;;  %v1107_v27 = vmul.f32 1.442695, %v1101_v9  ;;  %v1560_v60 = vmul.f32 %v1542_v56, %v1482_v40 }
 0x429   :  { %v1021_v46 = vpop.permute.xlu1 %1020  ;;  %v1544_v12 = vpop.f32.mrf.mxu1  ;;  %2342 = vpow2.f32 %v1109_v29 }
 0x42a   :  { %v1561_v52 = vmul.f32 %v1544_v12, %v3206_v4  ;;  %v3222_v13 = vpack.c.bf16 %v3210_v6, %v3192_v26  ;;  %v1031_v38 = vmul.f32 %v1030_v45, %v1021_v46  ;;  %2344 = vpow2.f32 %v1107_v27 }
 0x42b   :  { %v1546_v63 = vpop.f32.mrf.mxu1  ;;  %v3224_v54 = vpop.f32.mrf.mxu0 }
 0x42c   :  { %3585 = vst [vmem:[#allocation31_spill] sm:$0xff] %v3224_v54  ;;  %v3226_v22 = vpack.c.bf16 %v1561_v52, %v1559_v58  ;;  %v1562_v28 = vmul.f32 %v1546_v63, %v1484_v33  ;;  %v1083_v34 = vunpack.c.l.bf16 %v3222_v13  ;;  %v1084_v12 = vunpack.c.h.bf16 %v3222_v13  ;;  %v2339_v54 = vpop.eup %2338 }
 0x42d   :  { %v1613_v47 = vpop.f32.mrf.mxu0  ;;  %v1071_v52 = vmul.f32 %v2339_v54, %v3167_v62  ;;  %v3254_v62 = vmul.f32 %v530_v20, %v3178_v55 }
 0x42e   :  { %3586 = vst [vmem:[#allocation32_spill] sm:$0xff] %v3226_v22  ;;  %v1568_v43 = vpack.c.bf16 %v1562_v28, %v1560_v60  ;;  %v1035_v18 = vpop.permute.xlu1 %1034  ;;  %v3233_v4 = vsub.f32 %v3192_v26, %v1083_v34  ;;  %v3238_v58 = vsub.f32 %v3210_v6, %v1084_v12  ;;  %v1094_v34 = vrot.slane %v3178_v55, %v2952_v3  ;;  %v2341_v12 = vpop.eup %2340 }
 0x42f   :  { %v1041_v9 = vmul.f32 %v1035_v18, %v1030_v45  ;;  %v3235_v56 = vpop.f32.mrf.mxu0  ;;  %v3249_v63 = vmul.f32 %v1613_v47, %v1482_v40 }
 0x430   :  { %3587 = vst [vmem:[#allocation33_spill] sm:$0xff] %v3235_v56  ;;  %1674 = vmatprep.mubr.bf16.mxu1 %v1568_v43  ;;  %1723 = vmatprep.mubr.bf16.mxu0 %v1568_v43  ;;  %v1032_v43 = vmul.f32 %v1030_v45, %v3104_v21  ;;  %v1095_v47 = vmul.f32 %v1094_v34, %v2948_v1 }
 0x431   :  { %v1043_v28 = vsel %vm393_vm1, %v1031_v38, %v1041_v9  ;;  %v1617_v18 = vpop.f32.mrf.mxu0  ;;  %3588 = vst [vmem:[#allocation34_spill] sm:$0xff] %v3249_v63  ;;  %v1072_v38 = vmul.f32 %v2341_v12, %v3153_v61 }
 0x432   :  { %v1075_v29 = vadd.f32 %v1071_v52, %v1043_v28  ;;  %v3251_v60 = vmul.f32 %v1617_v18, %v1484_v33  ;;  %v1039_v48 = vpop.permute.xlu1 %1038  ;;  %v1096_v33 = vmul.f32 %v1094_v34, %v2942_v0  ;;  %v1148_v52 = vrot.slane %v3254_v62, %v2927_v53 }
 0x433   :  { %v1042_v54 = vmul.f32 %v1039_v48, %v1030_v45  ;;  %v1103_v45 = vmul.f32 1.442695, %v1095_v47 }
 0x434   :  { %3589 = vst [vmem:[#allocation35_spill] sm:$0xff] %v3251_v60  ;;  %v1105_v18 = vmul.f32 1.442695, %v1096_v33  ;;  %v1160_v12 = vmul.f32 %v3089_v30, %v1148_v52  ;;  %v1149_v53 = vmul.f32 %v1148_v52, %v3062_v8 }
 0x435   :  { %v1044_v9 = vsel %vm393_vm1, %v1032_v43, %v1042_v54  ;;  %2346 = vpow2.f32 %v1103_v45  ;;  %v1122_v45 = vrot.slane %v3254_v62, %v2952_v3 }
 0x436   :  { %v1076_v40 = vadd.f32 %v1072_v38, %v1044_v9  ;;  %v2343_v43 = vpop.eup %2342  ;;  %2348 = vpow2.f32 %v1105_v18 }
 0x437   :  { %v1143_v20 = vpop.permute.xlu1 %1142  ;;  %v2345_v9 = vpop.eup %2344  ;;  %v1166_v47 = vmul.f32 %v2343_v43, %v3210_v6 }
 0x438   :  { %v3265_v28 = vpack.c.bf16 %v1076_v40, %v1075_v29  ;;  %v1150_v21 = vmul.f32 %v1148_v52, %v1143_v20  ;;  %v1165_v33 = vmul.f32 %v2345_v9, %v3192_v26 }
 0x43a   :  { %v1081_v48 = vunpack.c.l.bf16 %v3265_v28  ;;  %v1082_v61 = vunpack.c.h.bf16 %v3265_v28  ;;  %v1162_v27 = vsel %vm393_vm1, %v1150_v21, %v1160_v12 }
 0x43b   :  { %v1170_v46 = vadd.f32 %v1166_v47, %v1162_v27  ;;  %v1133_v47 = vmul.f32 %v3120_v41, %v1122_v45 }
 0x43c   :  { %v1153_v54 = vpop.permute.xlu1 %1152  ;;  %v3270_v38 = vsub.f32 %v1075_v29, %v1081_v48  ;;  %v3272_v34 = vsub.f32 %v1076_v40, %v1082_v61  ;;  %v1192_v48 = vrot.slane %v3178_v55, %v2961_v11 }
 0x43d   :  { %v1159_v20 = vmul.f32 %v1153_v54, %v1148_v52 }
 0x43e   :  { %v1193_v52 = vmul.f32 %v1192_v48, %v2948_v1  ;;  %v1194_v6 = vmul.f32 %v1192_v48, %v2942_v0 }
 0x43f   :  { %v1161_v61 = vsel %vm393_vm1, %v1149_v53, %v1159_v20  ;;  %v1186_v20 = vrot.slane %v3178_v55, %v2986_v49 }
 0x440   :  { %v1169_v35 = vadd.f32 %v1165_v33, %v1161_v61  ;;  %v1199_v54 = vmul.f32 1.442695, %v1193_v52  ;;  %v1201_v9 = vmul.f32 1.442695, %v1194_v6 }
 0x441   :  { %v1113_v8 = vpop.permute.xlu1 %1112  ;;  %v1188_v6 = vmul.f32 %v1186_v20, %v2942_v0  ;;  %v1187_v60 = vmul.f32 %v1186_v20, %v2948_v1 }
 0x442   :  { %v3283_v56 = vpack.c.bf16 %v1170_v46, %v1169_v35  ;;  %v1123_v27 = vmul.f32 %v1122_v45, %v1113_v8  ;;  %v2347_v33 = vpop.eup %2346  ;;  %2350 = vpow2.f32 %v1199_v54 }
 0x443   :  { %v2349_v61 = vpop.eup %2348  ;;  %2352 = vpow2.f32 %v1201_v9  ;;  %v1197_v16 = vmul.f32 1.442695, %v1188_v6  ;;  %v1195_v22 = vmul.f32 1.442695, %v1187_v60  ;;  %v1284_v60 = vrot.slane %v3178_v55, %v3031_v2 }
 0x444   :  { %v1175_v26 = vunpack.c.l.bf16 %v3283_v56  ;;  %v1176_v21 = vunpack.c.h.bf16 %v3283_v56  ;;  %v1135_v3 = vsel %vm393_vm1, %v1123_v27, %v1133_v47  ;;  %v1164_v8 = vmul.f32 %v2349_v61, %v1076_v40 }
 0x445   :  { %v1117_v18 = vpop.permute.xlu1 %1116  ;;  %2354 = vpow2.f32 %v1197_v16 }
 0x446   :  { %v3291_v12 = vsub.f32 %v1169_v35, %v1175_v26  ;;  %v3293_v43 = vsub.f32 %v1170_v46, %v1176_v21  ;;  %v1124_v26 = vmul.f32 %v1122_v45, %v1117_v18  ;;  %v1163_v21 = vmul.f32 %v2347_v33, %v1075_v29  ;;  %v1205_v33 = vpop.permute.xlu0 %1204 }
 0x447   :  { %v1240_v29 = vrot.slane %v3254_v62, %v2961_v11  ;;  %2356 = vpow2.f32 %v1195_v22  ;;  %v1285_v22 = vmul.f32 %v1284_v60, %v2948_v1 }
 0x448   :  { %v1167_v53 = vadd.f32 %v1163_v21, %v1135_v3 }
 0x449   :  { %v1242_v11 = vmul.f32 %v1240_v29, %v3137_v17 }
 0x44a   :  { %v1131_v48 = vpop.permute.xlu1 %1130 }
 0x44b   :  { %v1134_v30 = vmul.f32 %v1131_v48, %v1122_v45 }
 0x44d   :  { %v1136_v52 = vsel %vm393_vm1, %v1124_v26, %v1134_v30 }
 0x44e   :  { %v1168_v63 = vadd.f32 %v1164_v8, %v1136_v52 }
 0x44f   :  { %v1231_v41 = vpop.permute.xlu1 %1230  ;;  %v2351_v47 = vpop.eup %2350 }
 0x450   :  { %v3304_v25 = vpack.c.bf16 %v1168_v63, %v1167_v53  ;;  %v1241_v20 = vmul.f32 %v1240_v29, %v1231_v41  ;;  %v2353_v61 = vpop.eup %2352  ;;  %v1257_v21 = vmul.f32 %v2351_v47, %v1169_v35  ;;  %v1214_v41 = vrot.slane %v3254_v62, %v2986_v49 }
 0x451   :  { %v1258_v8 = vmul.f32 %v2353_v61, %v1170_v46 }
 0x452   :  { %v1173_v18 = vunpack.c.l.bf16 %v3304_v25  ;;  %v1174_v45 = vunpack.c.h.bf16 %v3304_v25  ;;  %v2355_v47 = vpop.eup %2354  ;;  %v1215_v49 = vmul.f32 %v1214_v41, %v1205_v33 }
 0x454   :  { %v1245_v40 = vpop.permute.xlu1 %1244  ;;  %v3310_v30 = vsub.f32 %v1167_v53, %v1173_v18  ;;  %v3312_v27 = vsub.f32 %v1168_v63, %v1174_v45  ;;  %v1286_v18 = vmul.f32 %v1284_v60, %v2942_v0 }
 0x455   :  { %v1251_v54 = vmul.f32 %v1245_v40, %v1240_v29  ;;  %v1223_v40 = vpop.permute.xlu0 %1222 }
 0x456   :  { %3590 = vst [vmem:[#allocation36_spill] sm:$0xff] %v3310_v30  ;;  %3591 = vst [vmem:[#allocation37_spill] sm:$0xff] %v3312_v27 }
 0x457   :  { %v1253_v3 = vsel %vm393_vm1, %v1241_v20, %v1251_v54  ;;  %v1291_v54 = vmul.f32 1.442695, %v1285_v22  ;;  %v1226_v20 = vmul.f32 %v1223_v40, %v1214_v41  ;;  %v1278_v22 = vrot.slane %v3178_v55, %v3067_v15 }
 0x458   :  { %v1249_v48 = vpop.permute.xlu1 %1248  ;;  %v1261_v52 = vadd.f32 %v1257_v21, %v1253_v3  ;;  %v1256_v21 = vmul.f32 %v2355_v47, %v1168_v63 }
 0x459   :  { %v1252_v26 = vmul.f32 %v1249_v48, %v1240_v29  ;;  %v1293_v29 = vmul.f32 1.442695, %v1286_v18  ;;  %2358 = vpow2.f32 %v1291_v54  ;;  %v1279_v33 = vmul.f32 %v1278_v22, %v2948_v1 }
 0x45b   :  { %v1254_v16 = vsel %vm393_vm1, %v1242_v11, %v1252_v26  ;;  %v2357_v11 = vpop.eup %2356  ;;  %2360 = vpow2.f32 %v1293_v29  ;;  %v1337_v29 = vpop.permute.xlu0 %1336 }
 0x45c   :  { %v1262_v6 = vadd.f32 %v1258_v8, %v1254_v16  ;;  %v1255_v8 = vmul.f32 %v2357_v11, %v1167_v53  ;;  %v1287_v11 = vmul.f32 1.442695, %v1279_v33 }
 0x45d   :  { %v1209_v45 = vpop.permute.xlu1 %1208 }
 0x45e   :  { %v3325_v9 = vpack.c.bf16 %v1262_v6, %v1261_v52  ;;  %v1216_v17 = vmul.f32 %v1214_v41, %v1209_v45  ;;  %2362 = vpow2.f32 %v1287_v11 }
 0x45f   :  { %v1301_v7 = vpop.permute.xlu0 %1300 }
 0x460   :  { %v1267_v35 = vunpack.c.l.bf16 %v3325_v9  ;;  %v1268_v46 = vunpack.c.h.bf16 %v3325_v9  ;;  %v1228_v3 = vsel %vm393_vm1, %v1216_v17, %v1226_v20  ;;  %v1332_v17 = vrot.slane %v3254_v62, %v3031_v2 }
 0x461   :  { %v1260_v45 = vadd.f32 %v1256_v21, %v1228_v3 }
 0x462   :  { %v1219_v48 = vpop.permute.xlu1 %1218  ;;  %v3329_v61 = vsub.f32 %v1261_v52, %v1267_v35  ;;  %v3331_v60 = vsub.f32 %v1262_v6, %v1268_v46  ;;  %v1343_v21 = vmul.f32 %v1337_v29, %v1332_v17 }
 0x463   :  { %v1225_v26 = vmul.f32 %v1219_v48, %v1214_v41  ;;  %v1280_v41 = vmul.f32 %v1278_v22, %v2942_v0 }
 0x465   :  { %v1227_v18 = vsel %vm393_vm1, %v1215_v49, %v1225_v26  ;;  %v1289_v49 = vmul.f32 1.442695, %v1280_v41  ;;  %v1376_v26 = vrot.slane %v3178_v55, %v3094_v19 }
 0x466   :  { %v1259_v40 = vadd.f32 %v1255_v8, %v1227_v18  ;;  %v2359_v8 = vpop.eup %2358 }
 0x467   :  { %v1323_v35 = vpop.permute.xlu1 %1322  ;;  %2364 = vpow2.f32 %v1289_v49  ;;  %v1378_v33 = vmul.f32 %v1376_v26, %v2942_v0  ;;  %v1377_v27 = vmul.f32 %v1376_v26, %v2948_v1 }
 0x468   :  { %v3339_v46 = vpack.c.bf16 %v1260_v45, %v1259_v40  ;;  %v1333_v48 = vmul.f32 %v1332_v17, %v1323_v35  ;;  %v2361_v18 = vpop.eup %2360 }
 0x469   :  { %v1350_v30 = vmul.f32 %v2361_v18, %v1262_v6  ;;  %v1385_v31 = vmul.f32 1.442695, %v1378_v33  ;;  %v1306_v6 = vrot.slane %v3254_v62, %v3067_v15 }
 0x46a   :  { %v1265_v63 = vunpack.c.l.bf16 %v3339_v46  ;;  %v1266_v53 = vunpack.c.h.bf16 %v3339_v46  ;;  %v1345_v2 = vsel %vm393_vm1, %v1333_v48, %v1343_v21  ;;  %v1383_v48 = vmul.f32 1.442695, %v1377_v27  ;;  %v1415_v21 = vpop.permute.xlu0 %1414 }
 0x46b   :  { %v1327_v54 = vpop.permute.xlu1 %1326  ;;  %2366 = vpow2.f32 %v1385_v31  ;;  %v1370_v27 = vrot.slane %v3178_v55, %v3129_v14  ;;  %v2363_v26 = vpop.eup %2362  ;;  %v1308_v15 = vmul.f32 %v1306_v6, %v1301_v7  ;;  %v2386_v55 = vld [vmem:[%s3544_s10 + $0x8] sm:$0xff] }
 0x46c   :  { %v3347_v20 = vsub.f32 %v1259_v40, %v1265_v63  ;;  %v3349_v47 = vsub.f32 %v1260_v45, %v1266_v53  ;;  %v1334_v16 = vmul.f32 %v1332_v17, %v1327_v54  ;;  %v1349_v53 = vmul.f32 %v2359_v8, %v1261_v52 }
 0x46d   :  { %2368 = vpow2.f32 %v1383_v48 }
 0x46e   :  { %v1353_v41 = vadd.f32 %v1349_v53, %v1345_v2 }
 0x470   :  { %v1341_v22 = vpop.permute.xlu1 %1340 }
 0x471   :  { %v1344_v63 = vmul.f32 %v1341_v22, %v1332_v17 }
 0x473   :  { %v1346_v35 = vsel %vm393_vm1, %v1334_v16, %v1344_v63  ;;  %v1347_v63 = vmul.f32 %v2363_v26, %v1259_v40 }
 0x474   :  { %v1354_v3 = vadd.f32 %v1350_v30, %v1346_v35  ;;  %v2365_v22 = vpop.eup %2364  ;;  %v1371_v35 = vmul.f32 %v1370_v27, %v2948_v1 }
 0x475   :  { %v1297_v29 = vpop.permute.xlu1 %1296  ;;  %v1348_v53 = vmul.f32 %v2365_v22, %v1260_v45 }
 0x476   :  { %v3359_v32 = vpack.c.bf16 %v1354_v3, %v1353_v41  ;;  %v1307_v49 = vmul.f32 %v1306_v6, %v1297_v29  ;;  %v1372_v29 = vmul.f32 %v2386_v55, %v1370_v27  ;;  %v1379_v45 = vmul.f32 1.442695, %v1371_v35 }
 0x478   :  { %v1359_v17 = vunpack.c.l.bf16 %v3359_v32  ;;  %v1360_v52 = vunpack.c.h.bf16 %v3359_v32  ;;  %v2367_v26 = vpop.eup %2366  ;;  %2370 = vpow2.f32 %v1379_v45 }
 0x47a   :  { %v1311_v16 = vpop.permute.xlu1 %1310  ;;  %v3365_v54 = vsub.f32 %v1353_v41, %v1359_v17  ;;  %v3367_v0 = vsub.f32 %v1354_v3, %v1360_v52  ;;  %v1424_v17 = vrot.slane %v3254_v62, %v3094_v19  ;;  %v1433_v52 = vpop.permute.xlu0 %1432 }
 0x47b   :  { %v1317_v30 = vmul.f32 %v1311_v16, %v1306_v6  ;;  %v2369_v27 = vpop.eup %2368 }
 0x47c   :  { %v1366_v11 = vpack.c.bf16 %v3367_v0, %v3365_v54  ;;  %v3596_v54 = vpack.c.bf16 %v3331_v60, %v3329_v61 }
 0x47d   :  { %v1319_v18 = vsel %vm393_vm1, %v1307_v49, %v1317_v30  ;;  %v1436_v49 = vmul.f32 %v1433_v52, %v1424_v17 }
 0x47e   :  { %v1315_v8 = vpop.permute.xlu1 %1314  ;;  %v1351_v33 = vadd.f32 %v1347_v63, %v1319_v18  ;;  %v1425_v18 = vmul.f32 %v1424_v17, %v1415_v21  ;;  %v1442_v63 = vmul.f32 %v2367_v26, %v1354_v3 }
 0x47f   :  { %v1318_v2 = vmul.f32 %v1315_v8, %v1306_v6  ;;  %v1381_v6 = vmul.f32 1.442695, %v1372_v29 }
 0x481   :  { %v1320_v31 = vsel %vm393_vm1, %v1308_v15, %v1318_v2  ;;  %2372 = vpow2.f32 %v1381_v6 }
 0x482   :  { %v1352_v48 = vadd.f32 %v1348_v53, %v1320_v31  ;;  %v1441_v53 = vmul.f32 %v2369_v27, %v1353_v41  ;;  %v1403_v41 = vpop.permute.xlu0 %1402 }
 0x483   :  { %v1419_v7 = vpop.permute.xlu1 %1418 }
 0x484   :  { %v3381_v16 = vpack.c.bf16 %v1352_v48, %v1351_v33  ;;  %v1426_v40 = vmul.f32 %v1424_v17, %v1419_v7 }
 0x485   :  { %v2371_v26 = vpop.eup %2370 }
 0x486   :  { %v1357_v30 = vunpack.c.l.bf16 %v3381_v16  ;;  %v1358_v1 = vunpack.c.h.bf16 %v3381_v16  ;;  %v1438_v19 = vsel %vm393_vm1, %v1426_v40, %v1436_v49 }
 0x487   :  { %v1446_v55 = vadd.f32 %v1442_v63, %v1438_v19 }
 0x488   :  { %v1429_v8 = vpop.permute.xlu1 %1428  ;;  %v1361_v22 = vsub.f32 %v1351_v33, %v1357_v30  ;;  %v1362_v15 = vsub.f32 %v1352_v48, %v1358_v1 }
 0x489   :  { %v1435_v2 = vmul.f32 %v1429_v8, %v1424_v17  ;;  %v1398_v17 = vrot.slane %v3254_v62, %v3129_v14  ;;  %v3592_v14 = vpack.c.bf16 %v3238_v58, %v3233_v4  ;;  %v1439_v62 = vmul.f32 %v2371_v26, %v1351_v33 }
 0x48a   :  { %v1365_v31 = vpack.c.bf16 %v1362_v15, %v1361_v22  ;;  %v3593_v4 = vpack.c.bf16 %v3272_v34, %v3270_v38  ;;  %v3594_v33 = vpack.c.bf16 %v3159_v50, %v3157_v5  ;;  %v3595_v38 = vpack.c.bf16 %v3190_v57, %v3187_v39  ;;  %v1488_v50 = vld [vmem:[%s3549_s15 + $0x38] sm:$0xff]  ;;  %v1486_v57 = vld [vmem:[%s3549_s15 + $0x28] sm:$0xff] }
 0x48b   :  { %v1437_v35 = vsel %vm393_vm1, %v1425_v18, %v1435_v2  ;;  %v1409_v49 = vmul.f32 %v1403_v41, %v1398_v17  ;;  %v3597_v5 = vpack.c.bf16 %v3073_v23, %v3070_v51  ;;  %v3598_v39 = vpack.c.bf16 %v3349_v47, %v3347_v20  ;;  %v3601_v20 = vld [vmem:[#allocation26_spill] sm:$0xff]  ;;  %v3605_v41 = vld [vmem:[#allocation37_spill] sm:$0xff] }
 0x48c   :  { %v1445_v29 = vadd.f32 %v1441_v53, %v1437_v35  ;;  %v3599_v51 = vpack.c.bf16 %v3113_v42, %v3111_v44  ;;  %v3600_v23 = vpack.c.bf16 %v3293_v43, %v3291_v12  ;;  %v1487_v47 = vld [vmem:[%s3549_s15 + $0x30] sm:$0xff]  ;;  %v3608_v42 = vld [vmem:[#allocation32_spill] sm:$0xff] }
 0x48d   :  { %v1389_v7 = vpop.permute.xlu1 %1388  ;;  %v1485_v12 = vld [vmem:[%s3549_s15 + $0x20] sm:$0xff] }
 0x48e   :  { %v3387_v52 = vpack.c.bf16 %v1446_v55, %v1445_v29  ;;  %v1399_v6 = vmul.f32 %v1398_v17, %v1389_v7  ;;  %v2373_v22 = vpop.eup %2372 }
 0x48f   :  { %v1440_v19 = vmul.f32 %v2373_v22, %v1352_v48  ;;  %v3613_v22 = vld [vmem:[#allocation34_spill] sm:$0xff] }
 0x490   :  { %2065 = vmatprep.subr.bf16.mxu0 %v3387_v52  ;;  %v1451_v30 = vunpack.c.l.bf16 %v3387_v52  ;;  %v1452_v21 = vunpack.c.h.bf16 %v3387_v52  ;;  %v1411_v15 = vsel %vm393_vm1, %v1399_v6, %v1409_v49  ;;  %v3610_v6 = vld [vmem:[#allocation27_spill] sm:$0xff] }
 0x491   :  { %v1393_v3 = vpop.permute.xlu1 %1392  ;;  %2066 = vmatpush3.bf16.msra.mxu0 %v3222_v13  ;;  %v1443_v63 = vadd.f32 %v1439_v62, %v1411_v15 }
 0x492   :  { %v1455_v40 = vsub.f32 %v1445_v29, %v1451_v30  ;;  %v1456_v45 = vsub.f32 %v1446_v55, %v1452_v21  ;;  %v1400_v27 = vmul.f32 %v1398_v17, %v1393_v3 }
 0x494   :  { %v1458_v1 = vpack.c.bf16 %v1456_v45, %v1455_v40  ;;  %v3606_v40 = vld [vmem:[#allocation36_spill] sm:$0xff] }
 0x495   :  { %v3607_v44 = vpack.c.bf16 %v3605_v41, %v3606_v40  ;;  %v3609_v45 = vld [vmem:[#allocation28_spill] sm:$0xff] }
 0x496   :  { %v1407_v8 = vpop.permute.xlu1 %1406  ;;  %2037 = vmatprep.subr.bf16.mxu1 %v1458_v1  ;;  %v3611_v1 = vpack.c.bf16 %v3609_v45, %v3610_v6 }
 0x497   :  { %v1410_v18 = vmul.f32 %v1407_v8, %v1398_v17  ;;  %2038 = vmatpush3.bf16.msra.mxu1 %v3592_v14  ;;  %v3603_v17 = vld [vmem:[#allocation24_spill] sm:$0xff]  ;;  %v3612_v8 = vld [vmem:[#allocation35_spill] sm:$0xff] }
 0x498   :  { %v3614_v15 = vpack.c.bf16 %v3612_v8, %v3613_v22  ;;  %v3619_v8 = vld [vmem:[#allocation20_spill] sm:$0xff] }
 0x499   :  { %v1412_v2 = vsel %vm393_vm1, %v1400_v27, %v1410_v18  ;;  %v3618_v18 = vld [vmem:[#allocation31_spill] sm:$0xff]  ;;  %v1841_v22 = vsub.f32 0.0, %v3619_v8 }
 0x49a   :  { %v1444_v53 = vadd.f32 %v1440_v19, %v1412_v2 }
 0x49c   :  { %v1447_v35 = vpack.c.bf16 %v1444_v53, %v1443_v63 }
 0x49e   :  { %2067 = vmatprep.subr.bf16.mxu0 %v1447_v35  ;;  %v1449_v55 = vunpack.c.l.bf16 %v1447_v35  ;;  %v1450_v29 = vunpack.c.h.bf16 %v1447_v35 }
 0x49f   :  { %2068 = vmatpush3.bf16.msra.mxu0 %v3265_v28 }
 0x4a0   :  { %2069 = vmatprep.subr.bf16.mxu0 %v3359_v32  ;;  %v1453_v7 = vsub.f32 %v1443_v63, %v1449_v55  ;;  %v1454_v30 = vsub.f32 %v1444_v53, %v1450_v29 }
 0x4a2   :  { %v1457_v21 = vpack.c.bf16 %v1454_v30, %v1453_v7 }
 0x4a3   :  { %2070 = vmatpush3.bf16.msra.mxu0 %v3146_v59 }
 0x4a4   :  { %2039 = vmatprep.subr.bf16.mxu1 %v1457_v21  ;;  %2071 = vmatprep.subr.bf16.mxu0 %v3381_v16 }
 0x4a5   :  { %2040 = vmatpush3.bf16.msra.mxu1 %v3593_v4 }
 0x4a6   :  { %v1550_v58 = vpop.f32.mrf.mxu1  ;;  %2041 = vmatprep.subr.bf16.mxu1 %v1366_v11 }
 0x4a7   :  { %2072 = vmatpush3.bf16.msra.mxu0 %v3174_v36  ;;  %v1563_v49 = vmul.f32 %v1550_v58, %v1485_v12 }
 0x4a8   :  { %2073 = vmatprep.subr.bf16.mxu0 %v3325_v9  ;;  %v1552_v48 = vpop.f32.mrf.mxu1 }
 0x4a9   :  { %2042 = vmatpush3.bf16.msra.mxu1 %v3594_v33  ;;  %v1564_v60 = vmul.f32 %v1552_v48, %v1486_v57 }
 0x4aa   :  { %2043 = vmatprep.subr.bf16.mxu1 %v1365_v31  ;;  %v1554_v34 = vpop.f32.mrf.mxu1  ;;  %v3602_v31 = vld [vmem:[#allocation25_spill] sm:$0xff] }
 0x4ab   :  { %2074 = vmatpush3.bf16.msra.mxu0 %v3056_v37  ;;  %v3604_v3 = vpack.c.bf16 %v3602_v31, %v3603_v17  ;;  %v1565_v43 = vmul.f32 %v1554_v34, %v1487_v47 }
 0x4ac   :  { %2075 = vmatprep.subr.bf16.mxu0 %v3339_v46  ;;  %v1556_v0 = vpop.f32.mrf.mxu1 }
 0x4ad   :  { %2044 = vmatpush3.bf16.msra.mxu1 %v3595_v38  ;;  %v1566_v61 = vmul.f32 %v1556_v0, %v1488_v50  ;;  %v1569_v26 = vpack.c.bf16 %v1565_v43, %v1563_v49 }
 0x4ae   :  { %2045 = vmatprep.subr.bf16.mxu1 %v3596_v54 }
 0x4af   :  { %2076 = vmatpush3.bf16.msra.mxu0 %v3097_v24  ;;  %v1570_v11 = vpack.c.bf16 %v1566_v61, %v1564_v60 }
 0x4b0   :  { %2077 = vmatprep.subr.bf16.mxu0 %v3283_v56 }
 0x4b1   :  { %2046 = vmatpush3.bf16.msra.mxu1 %v3597_v5 }
 0x4b2   :  { %2047 = vmatprep.subr.bf16.mxu1 %v3598_v39 }
 0x4b3   :  { %2078 = vmatpush3.bf16.msra.mxu0 %v2993_v10 }
 0x4b4   :  { %2079 = vmatprep.subr.bf16.mxu0 %v3304_v25 }
 0x4b5   :  { %2048 = vmatpush3.bf16.msra.mxu1 %v3599_v51 }
 0x4b6   :  { %2049 = vmatprep.subr.bf16.mxu1 %v3600_v23 }
 0x4b7   :  { %2080 = vmatpush3.bf16.msra.mxu0 %v3601_v20 }
 0x4b9   :  { %2050 = vmatpush3.bf16.msra.mxu1 %v3604_v3 }
 0x4ba   :  { %2051 = vmatprep.subr.bf16.mxu1 %v3607_v44  ;;  %1724 = vmatmul.mubr.bf16.vlgmr.msra.gmra.mxu0 %v3608_v42 }
 0x4bb   :  { %1731 = vmatprep.mubr.bf16.mxu0 %v1570_v11 }
 0x4bd   :  { %2052 = vmatpush3.bf16.msra.mxu1 %v3611_v1 }
 0x4be   :  { %2093 = vmatprep.subr.bf16.mxu1 %v3387_v52  ;;  %v1621_v52 = vpop.f32.mrf.mxu0 }
 0x4c0   :  { %1675 = vmatmul.mubr.bf16.vlgmr.msra.gmra.mxu1 %v3608_v42 }
 0x4c1   :  { %1682 = vmatprep.mubr.bf16.mxu1 %v1570_v11  ;;  %2094 = vmatpush3.bf16.msra.mxu1 %v3222_v13  ;;  %v1623_v13 = vpop.f32.mrf.mxu0 }
 0x4c2   :  { %1732 = vmatmul.mubr.bf16.gmra.mxu0 %v1569_v26  ;;  %2095 = vmatprep.subr.bf16.mxu1 %v1447_v35 }
 0x4c5   :  { %2096 = vmatpush3.bf16.msra.mxu1 %v3265_v28  ;;  %v3615_v28 = vld [vmem:[#allocation30_spill] sm:$0xff] }
 0x4c6   :  { %2097 = vmatprep.subr.bf16.mxu1 %v3359_v32  ;;  %v1625_v32 = vpop.f32.mrf.mxu0 }
 0x4c8   :  { %1683 = vmatmul.mubr.bf16.gmra.mxu1 %v1569_v26 }
 0x4c9   :  { %2098 = vmatpush3.bf16.msra.mxu1 %v3146_v59  ;;  %1772 = vmatprep.mubr.bf16.mxu1 %v3614_v15  ;;  %v1627_v59 = vpop.f32.mrf.mxu0  ;;  %v1844_v15 = vmul.f32 1.442695, %v1841_v22 }
 0x4ca   :  { %2099 = vmatprep.subr.bf16.mxu1 %v3381_v16  ;;  %v3616_v16 = vld [vmem:[#allocation33_spill] sm:$0xff] }
 0x4cb   :  { %v1632_v27 = vmul.f32 %v3616_v16, %v3615_v28  ;;  %2374 = vpow2.f32 %v1844_v15 }
 0x4cd   :  { %2100 = vmatpush3.bf16.msra.mxu1 %v3174_v36  ;;  %v1637_v36 = vmul.f32 %v1627_v59, %v1488_v50  ;;  %v2001_v59 = vld [vmem:[#allocation11] ss:$0 sm:$0xff] }
 0x4ce   :  { %2101 = vmatprep.subr.bf16.mxu1 %v3325_v9  ;;  %v3617_v9 = vld [vmem:[#allocation29_spill] sm:$0xff] }
 0x4cf   :  { %v1630_v14 = vmul.f32 %v3618_v18, %v3617_v9 }
 0x4d1   :  { %2102 = vmatpush3.bf16.msra.mxu1 %v3056_v37  ;;  %v1635_v37 = vmul.f32 %v1623_v13, %v1486_v57 }
 0x4d2   :  { %2103 = vmatprep.subr.bf16.mxu1 %v3339_v46  ;;  %v1638_v46 = vpack.c.bf16 %v1632_v27, %v1630_v14  ;;  %v3621_v27 = vld [vmem:[#allocation22_spill] sm:$0xff] }
 0x4d3   :  { %v1641_v62 = vpack.c.bf16 %v1637_v36, %v1635_v37  ;;  %v1810_v36 = vmul.f32 %v2001_v59, %v3621_v27 }
 0x4d5   :  { %2104 = vmatpush3.bf16.msra.mxu1 %v3097_v24  ;;  %v1636_v24 = vmul.f32 %v1625_v32, %v1487_v47 }
 0x4d6   :  { %2105 = vmatprep.subr.bf16.mxu1 %v3283_v56  ;;  %v1634_v56 = vmul.f32 %v1621_v52, %v1485_v12  ;;  %v3620_v52 = vld [vmem:[#allocation21_spill] sm:$0xff] }
 0x4d7   :  { %v1840_v13 = vsub.f32 0.0, %v3620_v52 }
 0x4d8   :  { %v1640_v19 = vpack.c.bf16 %v1636_v24, %v1634_v56  ;;  %v2375_v28 = vpop.eup %2374 }
 0x4d9   :  { %2106 = vmatpush3.bf16.msra.mxu1 %v2993_v10  ;;  %v1842_v32 = vmul.f32 1.442695, %v1840_v13  ;;  %v1847_v18 = vadd.f32 1.0, %v2375_v28 }
 0x4da   :  { %2107 = vmatprep.subr.bf16.mxu1 %v3304_v25 }
 0x4db   :  { %2376 = vpow2.f32 %v1842_v32 }
 0x4dc   :  { %2378 = vrcp.f32 %v1847_v18 }
 0x4dd   :  { %2108 = vmatpush3.bf16.msra.mxu1 %v3601_v20 }
 0x4e0   :  { %1773 = vmatmul.mubr.bf16.vlgmr.msra.gmra.mxu1 %v1638_v46  ;;  %v3622_v46 = vld [vmem:[#allocation23_spill] sm:$0xff] }
 0x4e1   :  { %1780 = vmatprep.mubr.bf16.mxu1 %v1641_v62  ;;  %v1811_v62 = vmul.f32 %v2001_v59, %v3622_v46 }
 0x4e8   :  { %1781 = vmatmul.mubr.bf16.gmra.mxu1 %v1640_v19 }
 0x57a   :  { %v2081_v10 = vpop.f32.mrf.mxu0 }
 0x57c   :  { %v2082_v2 = vpop.f32.mrf.mxu0 }
 0x57d   :  { %v2083_v63 = vadd.f32 %v2082_v2, %v2081_v10  ;;  %v2377_v2 = vpop.eup %2376 }
 0x57e   :  { %v2084_v53 = vpop.f32.mrf.mxu0 }
 0x580   :  { %v2053_v25 = vpop.f32.mrf.mxu1  ;;  %v2085_v35 = vpop.f32.mrf.mxu0 }
 0x581   :  { %v2086_v55 = vadd.f32 %v2085_v35, %v2084_v53  ;;  %v2379_v35 = vpop.eup %2378 }
 0x582   :  { %v2054_v29 = vpop.f32.mrf.mxu1  ;;  %v2087_v54 = vpop.f32.mrf.mxu0 }
 0x583   :  { %v2055_v7 = vadd.f32 %v2054_v29, %v2053_v25  ;;  %v1846_v25 = vadd.f32 1.0, %v2377_v2 }
 0x584   :  { %v2056_v30 = vpop.f32.mrf.mxu1  ;;  %v2088_v0 = vpop.f32.mrf.mxu0 }
 0x585   :  { %v1726_v21 = vadd.f32 %v2083_v63, %v2055_v7  ;;  %v2089_v31 = vadd.f32 %v2088_v0, %v2087_v54  ;;  %2380 = vrcp.f32 %v1846_v25 }
 0x586   :  { %v2057_v4 = vpop.f32.mrf.mxu1  ;;  %v2090_v23 = vpop.f32.mrf.mxu0 }
 0x587   :  { %v2058_v58 = vadd.f32 %v2057_v4, %v2056_v30  ;;  %v1871_v30 = vld [vmem:[%s3547_s13 + $0x38] sm:$0xff]  ;;  %v1869_v4 = vld [vmem:[%s3547_s13 + $0x28] sm:$0xff] }
 0x588   :  { %v2059_v48 = vpop.f32.mrf.mxu1  ;;  %v2091_v3 = vpop.f32.mrf.mxu0  ;;  %2190 = vmatprep.subr.mxu0 %v1871_v30 }
 0x589   :  { %v1729_v33 = vadd.f32 %v2086_v55, %v2058_v58  ;;  %v2092_v43 = vadd.f32 %v2091_v3, %v2090_v23  ;;  %v1853_v55 = vmul.f32 %v2379_v35, %v3619_v8  ;;  %2191 = vmatpush3.msra.mxu0 %v1871_v30  ;;  %v1868_v58 = vld [vmem:[%s3547_s13 + $0x20] sm:$0xff] }
 0x58a   :  { %v2060_v38 = vpop.f32.mrf.mxu1 }
 0x58b   :  { %v2061_v20 = vadd.f32 %v2060_v38, %v2059_v48  ;;  %v1866_v48 = vld [vmem:[%s3547_s13 + $0x10] sm:$0xff]  ;;  %v1865_v38 = vld [vmem:[%s3547_s13 + $0x8] sm:$0xff] }
 0x58c   :  { %v2062_v34 = vpop.f32.mrf.mxu1 }
 0x58d   :  { %v1734_v40 = vadd.f32 %v2089_v31, %v2061_v20 }
 0x58e   :  { %v2063_v5 = vpop.f32.mrf.mxu1 }
 0x58f   :  { %v2064_v44 = vadd.f32 %v2063_v5, %v2062_v34  ;;  %v1864_v34 = vld [vmem:[%s3547_s13] sm:$0xff] }
 0x591   :  { %v1737_v1 = vadd.f32 %v2092_v43, %v2064_v44 }
 0x592   :  { %v2381_v29 = vpop.eup %2380 }
 0x593   :  { %v1852_v7 = vmul.f32 %v2381_v29, %v3620_v52 }
 0x5a0   :  { %v2109_v50 = vpop.f32.mrf.mxu1 }
 0x5a2   :  { %v2110_v39 = vpop.f32.mrf.mxu1 }
 0x5a3   :  { %v2111_v57 = vadd.f32 %v2110_v39, %v2109_v50 }
 0x5a4   :  { %v2112_v61 = vpop.f32.mrf.mxu1 }
 0x5a5   :  { %v1789_v51 = vadd.f32 %v2111_v57, %v1726_v21  ;;  %v1870_v21 = vld [vmem:[%s3547_s13 + $0x30] sm:$0xff] }
 0x5a6   :  { %v2113_v60 = vpop.f32.mrf.mxu1  ;;  %2192 = vmatprep.subr.mxu0 %v1870_v21 }
 0x5a7   :  { %v2114_v47 = vadd.f32 %v2113_v60, %v2112_v61  ;;  %2193 = vmatpush3.msra.mxu0 %v1870_v21 }
 0x5a8   :  { %v2115_v11 = vpop.f32.mrf.mxu1  ;;  %2194 = vmatprep.subr.mxu0 %v1869_v4 }
 0x5a9   :  { %v1790_v17 = vadd.f32 %v2114_v47, %v1729_v33  ;;  %2195 = vmatpush3.msra.mxu0 %v1869_v4  ;;  %v1867_v33 = vld [vmem:[%s3547_s13 + $0x18] sm:$0xff]  ;;  %s2584_s13 = smov [#allocation14]  }
 0x5aa   :  { %v2116_v41 = vpop.f32.mrf.mxu1  ;;  %2196 = vmatprep.subr.mxu0 %v1868_v58  ;;  %s1960_s10 = sshll.u32 %s2584_s13, 4  ;;  %s1961_s10 = int_to_ptr.vmem [resolvable:$true] %s1960_s10 }
 0x5ab   :  { %v2117_v42 = vadd.f32 %v2116_v41, %v2115_v11  ;;  %2197 = vmatpush3.msra.mxu0 %v1868_v58  ;;  %p2532_p8 = scmp.lt.s32.totalorder %s1961_s10, %s1961_s10 }
 0x5ac   :  { %v2118_v12 = vpop.f32.mrf.mxu1  ;;  %2198 = vmatprep.subr.mxu0 %v1867_v33 }
 0x5ad   :  { %v1791_v45 = vadd.f32 %v2117_v42, %v1734_v40  ;;  %2199 = vmatpush3.msra.mxu0 %v1867_v33 }
 0x5ae   :  { %v2119_v6 = vpop.f32.mrf.mxu1  ;;  %2200 = vmatprep.subr.mxu0 %v1866_v48 }
 0x5af   :  { %v2120_v49 = vadd.f32 %v2119_v6, %v2118_v12  ;;  %1795 = vrot.lane.b32.xlu1 %v1791_v45, %s2566_s11  ;;  %2201 = vmatpush3.msra.mxu0 %v1866_v48 }
 0x5b0   :  { %2202 = vmatprep.subr.mxu0 %v1865_v38 }
 0x5b1   :  { %v1792_v26 = vadd.f32 %v2120_v49, %v1737_v1  ;;  %2203 = vmatpush3.msra.mxu0 %v1865_v38 }
 0x5b2   :  { %2204 = vmatprep.subr.mxu0 %v1864_v34 }
 0x5b3   :  { %1797 = vrot.lane.b32.xlu0 %v1792_v26, %s2566_s11  ;;  %2205 = vmatpush3.msra.mxu0 %v1864_v34 }
 0x621   :  { %v1796_v16 = vpop.permute.xlu1 %1795 }
 0x622   :  { %v1801_v9 = vadd.f32 %v1796_v16, %v1789_v51  ;;  %v2002_v51 = vld [vmem:[%s3546_s12] ss:$0 sm:$0xff]  ;;  %s2527_s12 = scalar_lea.vmem %s1961_s10, 256 }
 0x623   :  { %p2528_p7 = scmp.ne.s32.totalorder %s1961_s10, %s2527_s12  ;;  %p2533_p9 = scmp.lt.s32.totalorder %s2527_s12, %s2527_s12 }
 0x624   :  { %v1812_v14 = vadd.f32 %v1810_v36, %v1801_v9 }
 0x625   :  { %v1798_v37 = vpop.permute.xlu0 %1797  ;;  %p2534_p10 = por %p2533_p9, %p2532_p8 }
 0x626   :  { %v1802_v24 = vadd.f32 %v1798_v37, %v1790_v17  ;;  %v1814_v56 = vmul.f32 %v1812_v14, %v1812_v14 }
 0x627   :  { %p2535_p11 = pnand %p2534_p10, %p2528_p7 }
 0x628   :  { %v1813_v19 = vadd.f32 %v1811_v62, %v1802_v24  ;;  %v1816_v10 = vsel %vm393_vm1, %v1814_v56, 0.0 }
 0x629   :  { %1817 = vadd.xlane.f32.xlu1 %v1816_v10 }
 0x62a   :  { %v1815_v63 = vmul.f32 %v1813_v19, %v1813_v19 }
 0x62c   :  { %v1819_v53 = vsel %vm393_vm1, %v1815_v63, 0.0 }
 0x62d   :  { %1820 = vadd.xlane.f32.xlu0 %v1819_v53 }
 0x63a   :  { %1858 = vrot.lane.b32.xlu1 %v1853_v55, %s2566_s11 }
 0x643   :  { %1856 = vrot.lane.b32.xlu0 %v1852_v7, %s2566_s11 }
 0x6b2   :  { %v1818_v54 = vpop.xlane.xlu1 %1817 }
 0x6b3   :  { %v1823_v5 = vmul.f32 0.015625, %v1818_v54 }
 0x6b5   :  { %v1825_v50 = vadd.f32 1e-05, %v1823_v5 }
 0x6b6   :  { %v1821_v0 = vpop.xlane.xlu0 %1820  ;;  %v1859_v3 = vpop.permute.xlu1 %1858 }
 0x6b7   :  { %2382 = vrsqrt.f32 %v1825_v50  ;;  %v1824_v39 = vmul.f32 0.015625, %v1821_v0 }
 0x6b9   :  { %v1826_v57 = vadd.f32 1e-05, %v1824_v39 }
 0x6ba   :  { %v1857_v47 = vpop.permute.xlu0 %1856 }
 0x6bb   :  { %2384 = vrsqrt.f32 %v1826_v57 }
 0x6c4   :  { %v2383_v61 = vpop.eup %2382 }
 0x6c5   :  { %v1829_v23 = vmul.f32 %v2383_v61, %v1812_v14 }
 0x6c7   :  { %v1838_v60 = vmul.f32 %v2002_v51, %v1829_v23 }
 0x6c8   :  { %v2385_v20 = vpop.eup %2384 }
 0x6c9   :  { %v1830_v11 = vmul.f32 %v2385_v20, %v1813_v19  ;;  %v1862_v31 = vmul.f32 %v1857_v47, %v1838_v60 }
 0x6cb   :  { %v1839_v17 = vmul.f32 %v2002_v51, %v1830_v11  ;;  %2206 = vmatprep.mubr.msk.f32.mxu0 %vm393_vm1, %v1862_v31 }
 0x6cd   :  { %v1863_v41 = vmul.f32 %v1859_v3, %v1839_v17 }
 0x6cf   :  { %2207 = vmatmul.mubr.msk.f32.vlgmr.msra.gmra.mxu0 %vm393_vm1, %v1863_v41 }
 0x78f   :  { %v2208_v40 = vpop.f32.mrf.mxu0 }
 0x790   :  { %1954 = vst.msk [vmem:[#allocation14 + $0x8] sm:$0xff] %vm144_vm0, %v2208_v40 }
 0x791   :  { %v1944_v44 = vpop.f32.mrf.mxu0 }
 0x792   :  { %1953 = vst.msk [vmem:[#allocation14] sm:$0xff] %vm144_vm0, %v1944_v44 }
 0x793   :  { %2538 = shalt.err (!%p2535_p11)
}
 0x794   :  { %1966 = dma.vmem_to_hbm [thread:$0]  %s1961_s10, 256, %s3550_s16, [#allocation4], %s2561_s7, %s2561_s7, %s2562_s24  }
 0x795   :  { %2555 = dma.done.wait [#allocation4], 256  }
 0x796   :  { %2556 = vsyncadd [#allocation4], 4294967040 }
 0x797   :  { %1970 = vsyncpa [#allocation3], 1 }
 0x798   :  { %1971 = vsyncpa [#allocation6], 1 }
 0x799   :  { %1972 = vsyncpa [#allocation9], 1 }
 0x79a   :  { %1973 = vsyncpa [#allocation12], 1 }
 0x79b   :  { %1974 = vsyncpa [#allocation4], 1 }

</bundles_post_ra>
